<compile_context>
chip_gen: v6e
topology: v6e:2x2x1
jax: 0.10.0
libtpu: 0.0.40
codegen_flags: <defaults>
</compile_context>

<pallas_src>
import functools

import jax
import jax.numpy as jnp
from jax.experimental import pallas as pl
from jax.experimental.pallas import tpu as pltpu


def _round_up(x, m):
    return (x + m - 1) // m * m


# ----------------------------------------------------------------------------
# Fused ensemble conv: one im2col matmul per image on the MXU.
# ----------------------------------------------------------------------------
def ens_conv2d_pallas(x_nchw, w_oihw, bias, *, padding):
    """Stride-1 Conv2d (== EnsConv2d forward with stacked client filters).

    x_nchw: (N, Cin, H, W) f32
    w_oihw: (Cout, Cin, K, K) f32   (per-client filters concatenated along O)
    bias:   (Cout,) f32
    returns (N, Cout, Ho, Wo) f32
    """
    N, Cin, H, W = x_nchw.shape
    Cout, Cin_w, K, K2 = w_oihw.shape
    assert Cin_w == Cin and K2 == K
    P = int(padding)
    Hp, Wp = H + 2 * P, W + 2 * P
    Ho, Wo = Hp - K + 1, Wp - K + 1
    assert Ho > 0 and Wo > 0
    KK = K * K
    Cout_p = _round_up(Cout, 128)          # lane-dense matmul N dim & stores

    # ---- one-time (XLA-side) parameter layout prep -------------------------
    # OIHW -> (K*K*Cin, Cout_p), tap-major order matching the in-kernel im2col,
    # zero-padded on the output-channel axis, bf16 for the MXU.
    w_mat = jnp.transpose(w_oihw, (2, 3, 1, 0)).reshape(KK * Cin, Cout)
    w_mat = jnp.pad(w_mat, ((0, 0), (0, Cout_p - Cout))).astype(jnp.bfloat16)
    b_row = jnp.pad(bias.astype(jnp.float32), (0, Cout_p - Cout)).reshape(1, Cout_p)
    x_nhwc = jnp.transpose(x_nchw, (0, 2, 3, 1)).astype(jnp.float32)  # NHWC

    def kernel(x_ref, w_ref, b_ref, o_ref, xp_ref, patch_ref):
        # 1) zero-pad the image into a VMEM scratch (conv padding, in-kernel).
        if P > 0:
            xp_ref[...] = jnp.zeros_like(xp_ref)
            xp_ref[P:P + H, P:P + W, :] = x_ref[0]
        else:
            xp_ref[...] = x_ref[0]
        # 2) im2col: write the K*K shifted taps into one (Ho*Wo, K*K*Cin)
        #    patch matrix -> a single big matmul instead of K*K tiny ones.
        for dy in range(K):
            for dx in range(K):
                tap = xp_ref[dy:dy + Ho, dx:dx + Wo, :].reshape(Ho * Wo, Cin)
                t = (dy * K + dx) * Cin
                patch_ref[:, t:t + Cin] = tap
        # 3) one MXU matmul: bf16 operands, f32 accumulation, lane-dense N dim.
        acc = jnp.dot(patch_ref[...].astype(jnp.bfloat16), w_ref[...],
                      preferred_element_type=jnp.float32)      # (Ho*Wo, Cout_p)
        # 4) bias epilogue on the lane-dense layout + unmasked store.
        o_ref[...] = (acc + b_ref[...])[None]

    out = pl.pallas_call(
        kernel,
        out_shape=jax.ShapeDtypeStruct((N, Ho * Wo, Cout_p), jnp.float32),
        grid=(N,),
        in_specs=[
            pl.BlockSpec((1, H, W, Cin), lambda n: (n, 0, 0, 0)),
            pl.BlockSpec((KK * Cin, Cout_p), lambda n: (0, 0)),   # resident
            pl.BlockSpec((1, Cout_p), lambda n: (0, 0)),          # resident
        ],
        out_specs=pl.BlockSpec((1, Ho * Wo, Cout_p), lambda n: (n, 0, 0)),
        scratch_shapes=[
            pltpu.VMEM((Hp, Wp, Cin), jnp.float32),        # padded image
            pltpu.VMEM((Ho * Wo, KK * Cin), jnp.float32),  # im2col patches
        ],
        compiler_params=pltpu.CompilerParams(
            dimension_semantics=("parallel",)),
    )(x_nhwc, w_mat, b_row)

    out = out[:, :, :Cout].reshape(N, Ho, Wo, Cout)   # drop channel padding
    return jnp.transpose(out, (0, 3, 1, 2))           # NHWC -> NCHW


# ----------------------------------------------------------------------------
# EnsConv2d module equivalent (forward only)
# ----------------------------------------------------------------------------
def make_ens_conv_params(key, in_channel, out_channel, kernel_size, client_num):
    """Per-client Conv2d params (PyTorch OIHW weight + bias), as in EnsConv2d."""
    assert out_channel % client_num == 0
    oc = out_channel // client_num
    fan_in = in_channel * kernel_size * kernel_size
    bound = 1.0 / (fan_in ** 0.5)
    weights, biases = [], []
    for k in jax.random.split(key, client_num):
        kw, kb = jax.random.split(k)
        weights.append(jax.random.uniform(
            kw, (oc, in_channel, kernel_size, kernel_size),
            jnp.float32, -bound, bound))
        biases.append(jax.random.uniform(kb, (oc,), jnp.float32, -bound, bound))
    return weights, biases


def ens_conv2d_forward(x_nchw, weights, biases, padding):
    # torch.cat([conv_i(x)], dim=1) == one conv with filters stacked along O.
    w_cat = jnp.concatenate(weights, axis=0)
    b_cat = jnp.concatenate(biases, axis=0)
    return ens_conv2d_pallas(x_nchw, w_cat, b_cat, padding=padding)


def ens_conv2d_reference(x_nchw, weights, biases, padding):
    """Pure-XLA reference (same bf16 operand rounding as the kernel)."""
    x_r = x_nchw.astype(jnp.bfloat16).astype(jnp.float32)
    outs = []
    for w, b in zip(weights, biases):
        w_r = w.astype(jnp.bfloat16).astype(jnp.float32)
        y = jax.lax.conv_general_dilated(
            x_r, w_r, window_strides=(1, 1),
            padding=[(padding, padding), (padding, padding)],
            dimension_numbers=("NCHW", "OIHW", "NCHW"),
            precision=jax.lax.Precision.HIGHEST)
        outs.append(y + b.astype(jnp.float32).reshape(1, -1, 1, 1))
    return jnp.concatenate(outs, axis=1)


if __name__ == "__main__":
    key = jax.random.PRNGKey(0)
    kx, kp = jax.random.split(key)

    # EnsConv2d(in_channel=4, out_channel=8, kernel_size=3, padding=1,
    #           client_id=0, client_num=2).  client_id only freezes grads.
    N, Cin, Cout, H, W = 2, 4, 8, 16, 16
    kernel_size, padding, client_num = 3, 1, 2

    x = jax.random.normal(kx, (N, Cin, H, W), jnp.float32)
    weights, biases = make_ens_conv_params(kp, Cin, Cout, kernel_size, client_num)

    fwd = jax.jit(functools.partial(ens_conv2d_forward, padding=padding))
    out = jax.block_until_ready(fwd(x, weights, biases))

    assert out.shape == (N, Cout, H, W), out.shape
    assert bool(jnp.all(jnp.isfinite(out)))
    ref = ens_conv2d_reference(x, weights, biases, padding)
    err = float(jnp.max(jnp.abs(out - ref)))
    assert jnp.allclose(out, ref, atol=2e-3, rtol=2e-3), err
    print("KERNEL_OK")
</pallas_src>

<mosaic_0001>
module attributes {stable_mosaic.version = 11 : i64} {
  func.func @kernel(%arg0: i32, %arg1: memref<1x16x16x4xf32, #tpu.memory_space<vmem>>, %arg2: memref<36x128xbf16, #tpu.memory_space<vmem>>, %arg3: memref<1x128xf32, #tpu.memory_space<vmem>>, %arg4: memref<1x256x128xf32, #tpu.memory_space<vmem>>, %arg5: memref<18x18x4xf32, #tpu.memory_space<vmem>>, %arg6: memref<256x36xf32, #tpu.memory_space<vmem>>) attributes {dimension_semantics = [#tpu.dimension_semantics<parallel>], iteration_bounds = array<i64: 2>, scalar_prefetch = 0 : i64, scratch_operands = 2 : i64, tpu.core_type = #tpu.core_type<tc>, window_params = [{transform_indices = @transform_0, window_bounds = array<i64: 1, 16, 16, 4>}, {pipeline_mode = #tpu.pipeline_mode<synchronous>, transform_indices = @transform_1, window_bounds = array<i64: 36, 128>}, {pipeline_mode = #tpu.pipeline_mode<synchronous>, transform_indices = @transform_2, window_bounds = array<i64: 1, 128>}, {transform_indices = @transform_3, window_bounds = array<i64: 1, 256, 128>}]} {
    %cst = arith.constant 0.000000e+00 : f32
    %0 = vector.broadcast %cst : f32 to vector<18x18x4xf32>
    %c0 = arith.constant 0 : index
    %c0_0 = arith.constant 0 : index
    %c0_1 = arith.constant 0 : index
    %1 = vector.load %arg5[%c0, %c0_0, %c0_1] : memref<18x18x4xf32, #tpu.memory_space<vmem>>, vector<18x18x4xf32>
    tpu.vector_store %arg5[%c0, %c0_0, %c0_1], %0 {strides = array<i32>} : memref<18x18x4xf32, #tpu.memory_space<vmem>>, vector<18x18x4xf32>,
    %c0_2 = arith.constant 0 : index
    %c0_3 = arith.constant 0 : index
    %c0_4 = arith.constant 0 : index
    %c0_5 = arith.constant 0 : index
    %2 = vector.load %arg1[%c0_2, %c0_3, %c0_4, %c0_5] : memref<1x16x16x4xf32, #tpu.memory_space<vmem>>, vector<1x16x16x4xf32>
    %3 = vector.shape_cast %2 : vector<1x16x16x4xf32> to vector<16x16x4xf32>
    %c1 = arith.constant 1 : index
    %c1_6 = arith.constant 1 : index
    %c0_7 = arith.constant 0 : index
    %4 = vector.load %arg5[%c1, %c1_6, %c0_7] : memref<18x18x4xf32, #tpu.memory_space<vmem>>, vector<16x16x4xf32>
    tpu.vector_store %arg5[%c1, %c1_6, %c0_7], %3 {strides = array<i32>} : memref<18x18x4xf32, #tpu.memory_space<vmem>>, vector<16x16x4xf32>,
    %c0_8 = arith.constant 0 : index
    %c0_9 = arith.constant 0 : index
    %c0_10 = arith.constant 0 : index
    %5 = vector.load %arg5[%c0_8, %c0_9, %c0_10] : memref<18x18x4xf32, #tpu.memory_space<vmem>>, vector<16x16x4xf32>
    %6 = vector.shape_cast %5 : vector<16x16x4xf32> to vector<256x4xf32>
    %c0_11 = arith.constant 0 : index
    %c0_12 = arith.constant 0 : index
    %7 = vector.load %arg6[%c0_11, %c0_12] : memref<256x36xf32, #tpu.memory_space<vmem>>, vector<256x4xf32>
    tpu.vector_store %arg6[%c0_11, %c0_12], %6 {strides = array<i32>} : memref<256x36xf32, #tpu.memory_space<vmem>>, vector<256x4xf32>,
    %c0_13 = arith.constant 0 : index
    %c1_14 = arith.constant 1 : index
    %c0_15 = arith.constant 0 : index
    %8 = vector.load %arg5[%c0_13, %c1_14, %c0_15] : memref<18x18x4xf32, #tpu.memory_space<vmem>>, vector<16x16x4xf32>
    %9 = vector.shape_cast %8 : vector<16x16x4xf32> to vector<256x4xf32>
    %c0_16 = arith.constant 0 : index
    %c4 = arith.constant 4 : index
    %10 = vector.load %arg6[%c0_16, %c4] : memref<256x36xf32, #tpu.memory_space<vmem>>, vector<256x4xf32>
    tpu.vector_store %arg6[%c0_16, %c4], %9 {strides = array<i32>} : memref<256x36xf32, #tpu.memory_space<vmem>>, vector<256x4xf32>,
    %c0_17 = arith.constant 0 : index
    %c2 = arith.constant 2 : index
    %c0_18 = arith.constant 0 : index
    %11 = vector.load %arg5[%c0_17, %c2, %c0_18] : memref<18x18x4xf32, #tpu.memory_space<vmem>>, vector<16x16x4xf32>
    %12 = vector.shape_cast %11 : vector<16x16x4xf32> to vector<256x4xf32>
    %c0_19 = arith.constant 0 : index
    %c8 = arith.constant 8 : index
    %13 = vector.load %arg6[%c0_19, %c8] : memref<256x36xf32, #tpu.memory_space<vmem>>, vector<256x4xf32>
    tpu.vector_store %arg6[%c0_19, %c8], %12 {strides = array<i32>} : memref<256x36xf32, #tpu.memory_space<vmem>>, vector<256x4xf32>,
    %c1_20 = arith.constant 1 : index
    %c0_21 = arith.constant 0 : index
    %c0_22 = arith.constant 0 : index
    %14 = vector.load %arg5[%c1_20, %c0_21, %c0_22] : memref<18x18x4xf32, #tpu.memory_space<vmem>>, vector<16x16x4xf32>
    %15 = vector.shape_cast %14 : vector<16x16x4xf32> to vector<256x4xf32>
    %c0_23 = arith.constant 0 : index
    %c12 = arith.constant 12 : index
    %16 = vector.load %arg6[%c0_23, %c12] : memref<256x36xf32, #tpu.memory_space<vmem>>, vector<256x4xf32>
    tpu.vector_store %arg6[%c0_23, %c12], %15 {strides = array<i32>} : memref<256x36xf32, #tpu.memory_space<vmem>>, vector<256x4xf32>,
    %c1_24 = arith.constant 1 : index
    %c1_25 = arith.constant 1 : index
    %c0_26 = arith.constant 0 : index
    %17 = vector.load %arg5[%c1_24, %c1_25, %c0_26] : memref<18x18x4xf32, #tpu.memory_space<vmem>>, vector<16x16x4xf32>
    %18 = vector.shape_cast %17 : vector<16x16x4xf32> to vector<256x4xf32>
    %c0_27 = arith.constant 0 : index
    %c16 = arith.constant 16 : index
    %19 = vector.load %arg6[%c0_27, %c16] : memref<256x36xf32, #tpu.memory_space<vmem>>, vector<256x4xf32>
    tpu.vector_store %arg6[%c0_27, %c16], %18 {strides = array<i32>} : memref<256x36xf32, #tpu.memory_space<vmem>>, vector<256x4xf32>,
    %c1_28 = arith.constant 1 : index
    %c2_29 = arith.constant 2 : index
    %c0_30 = arith.constant 0 : index
    %20 = vector.load %arg5[%c1_28, %c2_29, %c0_30] : memref<18x18x4xf32, #tpu.memory_space<vmem>>, vector<16x16x4xf32>
    %21 = vector.shape_cast %20 : vector<16x16x4xf32> to vector<256x4xf32>
    %c0_31 = arith.constant 0 : index
    %c20 = arith.constant 20 : index
    %22 = vector.load %arg6[%c0_31, %c20] : memref<256x36xf32, #tpu.memory_space<vmem>>, vector<256x4xf32>
    tpu.vector_store %arg6[%c0_31, %c20], %21 {strides = array<i32>} : memref<256x36xf32, #tpu.memory_space<vmem>>, vector<256x4xf32>,
    %c2_32 = arith.constant 2 : index
    %c0_33 = arith.constant 0 : index
    %c0_34 = arith.constant 0 : index
    %23 = vector.load %arg5[%c2_32, %c0_33, %c0_34] : memref<18x18x4xf32, #tpu.memory_space<vmem>>, vector<16x16x4xf32>
    %24 = vector.shape_cast %23 : vector<16x16x4xf32> to vector<256x4xf32>
    %c0_35 = arith.constant 0 : index
    %c24 = arith.constant 24 : index
    %25 = vector.load %arg6[%c0_35, %c24] : memref<256x36xf32, #tpu.memory_space<vmem>>, vector<256x4xf32>
    tpu.vector_store %arg6[%c0_35, %c24], %24 {strides = array<i32>} : memref<256x36xf32, #tpu.memory_space<vmem>>, vector<256x4xf32>,
    %c2_36 = arith.constant 2 : index
    %c1_37 = arith.constant 1 : index
    %c0_38 = arith.constant 0 : index
    %26 = vector.load %arg5[%c2_36, %c1_37, %c0_38] : memref<18x18x4xf32, #tpu.memory_space<vmem>>, vector<16x16x4xf32>
    %27 = vector.shape_cast %26 : vector<16x16x4xf32> to vector<256x4xf32>
    %c0_39 = arith.constant 0 : index
    %c28 = arith.constant 28 : index
    %28 = vector.load %arg6[%c0_39, %c28] : memref<256x36xf32, #tpu.memory_space<vmem>>, vector<256x4xf32>
    tpu.vector_store %arg6[%c0_39, %c28], %27 {strides = array<i32>} : memref<256x36xf32, #tpu.memory_space<vmem>>, vector<256x4xf32>,
    %c2_40 = arith.constant 2 : index
    %c2_41 = arith.constant 2 : index
    %c0_42 = arith.constant 0 : index
    %29 = vector.load %arg5[%c2_40, %c2_41, %c0_42] : memref<18x18x4xf32, #tpu.memory_space<vmem>>, vector<16x16x4xf32>
    %30 = vector.shape_cast %29 : vector<16x16x4xf32> to vector<256x4xf32>
    %c0_43 = arith.constant 0 : index
    %c32 = arith.constant 32 : index
    %31 = vector.load %arg6[%c0_43, %c32] : memref<256x36xf32, #tpu.memory_space<vmem>>, vector<256x4xf32>
    tpu.vector_store %arg6[%c0_43, %c32], %30 {strides = array<i32>} : memref<256x36xf32, #tpu.memory_space<vmem>>, vector<256x4xf32>,
    %c0_44 = arith.constant 0 : index
    %c0_45 = arith.constant 0 : index
    %32 = vector.load %arg6[%c0_44, %c0_45] : memref<256x36xf32, #tpu.memory_space<vmem>>, vector<256x36xf32>
    %33 = arith.truncf %32 : vector<256x36xf32> to vector<256x36xbf16>
    %c0_46 = arith.constant 0 : index
    %c0_47 = arith.constant 0 : index
    %34 = vector.load %arg2[%c0_46, %c0_47] : memref<36x128xbf16, #tpu.memory_space<vmem>>, vector<36x128xbf16>
    %cst_48 = arith.constant dense<0.000000e+00> : vector<256x128xf32>
    %35 = tpu.matmul %33, %34, %cst_48 {dimension_numbers = #tpu.dot_dimension_numbers<[1], [0], [0], [1], [0, 0, 1, 1], [], []>} : vector<256x36xbf16>, vector<36x128xbf16>, vector<256x128xf32> -> vector<256x128xf32>
    %c0_49 = arith.constant 0 : index
    %c0_50 = arith.constant 0 : index
    %36 = vector.load %arg3[%c0_49, %c0_50] : memref<1x128xf32, #tpu.memory_space<vmem>>, vector<1x128xf32>
    %37 = vector.broadcast %36 : vector<1x128xf32> to vector<256x128xf32>
    %38 = arith.addf %35, %37 : vector<256x128xf32>
    %39 = vector.shape_cast %38 : vector<256x128xf32> to vector<1x256x128xf32>
    %c0_51 = arith.constant 0 : index
    %c0_52 = arith.constant 0 : index
    %c0_53 = arith.constant 0 : index
    %40 = vector.load %arg4[%c0_51, %c0_52, %c0_53] : memref<1x256x128xf32, #tpu.memory_space<vmem>>, vector<1x256x128xf32>
    tpu.vector_store %arg4[%c0_51, %c0_52, %c0_53], %39 {strides = array<i32>} : memref<1x256x128xf32, #tpu.memory_space<vmem>>, vector<1x256x128xf32>,
    return
  }
  func.func @transform_0(%arg0: i32) -> (i32, i32, i32, i32) {
    %c0_i32 = arith.constant 0 : i32
    %c0_i32_0 = arith.constant 0 : i32
    %c0_i32_1 = arith.constant 0 : i32
    %c0_i32_2 = arith.constant 0 : i32
    return %arg0, %c0_i32, %c0_i32_0, %c0_i32_1 : i32, i32, i32, i32
  }
  func.func @transform_1(%arg0: i32) -> (i32, i32) {
    %c0_i32 = arith.constant 0 : i32
    %c0_i32_0 = arith.constant 0 : i32
    %c0_i32_1 = arith.constant 0 : i32
    return %c0_i32, %c0_i32_0 : i32, i32
  }
  func.func @transform_2(%arg0: i32) -> (i32, i32) {
    %c0_i32 = arith.constant 0 : i32
    %c0_i32_0 = arith.constant 0 : i32
    %c0_i32_1 = arith.constant 0 : i32
    return %c0_i32, %c0_i32_0 : i32, i32
  }
  func.func @transform_3(%arg0: i32) -> (i32, i32, i32) {
    %c0_i32 = arith.constant 0 : i32
    %c0_i32_0 = arith.constant 0 : i32
    %c0_i32_1 = arith.constant 0 : i32
    return %arg0, %c0_i32, %c0_i32_0 : i32, i32, i32
  }
}

</mosaic_0001>

<bundles_post_ra>
// kernel: ens_conv2d_forward.1
= control target key start
LH: loop header
LB: loop body
LE: loop exit
PB: predicated region body
PF: predicated region fallthrough
CT: control target
= control target key end

     0   :  { %s2433_s12 = smov 0   ;;  %s3579_s0 = inlined_call_operand.vmem [shape: f32[2,16,16,4], index: 0, kind: input, shape index: {}]   ;;  %s3580_s1 = inlined_call_operand.vmem [shape: bf16[36,128], index: 1, kind: input, shape index: {}]   ;;  %s3581_s2 = inlined_call_operand.vmem [shape: f32[1,128], index: 2, kind: input, shape index: {}]   ;;  %s3582_s3 = inlined_call_operand.vmem [shape: f32[2,256,128], index: 3, kind: output, shape index: {}]  }
   0x1 LB: > { %s2278_s13 = sadd.s32 4294967295, %s2402_s12   ;;  %p2282_p0 = scmp.ge.s32.totalorder %s2402_s12, 1  ;;  %s2402_s12 = sphi %s2433_s12, %s13_s12  }
   0x2   : > { %p137_p1 = scmp.lt.s32.totalorder %s2402_s12, 3 }
   0x4   : > { %p138_p2 = pnand %p2282_p0, %p137_p1 }
   0x6   : > { %141 = sbr.rel (%p138_p2) target bundleno = 882 (0x372), region = 32 }
   0xb   : > { %vm172_vm0 = vcmask 31744   ;;  %vm175_vm1 = vcmask 25600   ;;  %p2443_p3 = scmp.lt.s32.totalorder %s2278_s13, 1  ;;  %v2404_v0 = vmov 0.0   ;;  %s2405_s19 = smov 4   ;;  %vm517_vm2 = vcmask 64544  }
   0xc   : > { %173 = vst.msk [vmem:[#allocation2] sm:$0xff] %vm172_vm0, %v2404_v0  ;;  %174 = vst.msk [vmem:[#allocation2 + $0x8] sm:$0xff] %vm172_vm0, %v2404_v0  ;;  %s2406_s20 = smov 8   ;;  %s2407_s21 = smov 12   ;;  %vm710_vm3 = vcmask 97344   ;;  %vm903_vm4 = vcmask 130144  }
   0xd   : > { %177 = vst.msk [vmem:[#allocation2 + $0x18] sm:$0xff] %vm172_vm0, %v2404_v0  ;;  %178 = vst.msk [vmem:[#allocation2 + $0x20] sm:$0xff] %vm172_vm0, %v2404_v0  ;;  %s3616_s13 = smov (!%p2443_p3, %s2278_s13), 1  ;;  %s2408_s22 = smov 16   ;;  %vm2026_vm5 = vcmask 1041408   ;;  %vm1096_vm6 = vcmask 162944  }
   0xe   : > { %180 = vst.msk [vmem:[#allocation2 + $0x30] sm:$0xff] %vm172_vm0, %v2404_v0  ;;  %181 = vst.msk [vmem:[#allocation2 + $0x38] sm:$0xff] %vm172_vm0, %v2404_v0  ;;  %s2309_s15 = sshll.u32 %s3616_s13, 8  ;;  %s2409_s23 = smov 20   ;;  %vm1289_vm7 = vcmask 195744   ;;  %vm1483_vm8 = vcmask 228544  }
   0xf   : > { %183 = vst.msk [vmem:[#allocation2 + $0x48] sm:$0xff] %vm172_vm0, %v2404_v0  ;;  %184 = vst.msk [vmem:[#allocation2 + $0x50] sm:$0xff] %vm172_vm0, %v2404_v0  ;;  %s2513_s18 = scalar_lea.vmem %s3579_s0, %s2309_s15  ;;  %s2410_s24 = smov 24   ;;  %vm1676_vm9 = vcmask 261344   ;;  %vm1869_vm10 = vcmask 294144   ;;  %vm1977_vm11 = vcmask 293888  }
  0x10   : > { %186 = vst.msk [vmem:[#allocation2 + $0x60] sm:$0xff] %vm172_vm0, %v2404_v0  ;;  %187 = vst.msk [vmem:[#allocation2 + $0x68] sm:$0xff] %vm172_vm0, %v2404_v0  ;;  %v228_v1 = vld [vmem:[%s2513_s18] sm:$0xff]  ;;  %v230_v2 = vld [vmem:[%s2513_s18 + $0x10] sm:$0xff]  ;;  %s2411_s25 = smov 28   ;;  %s2412_s30 = smov 32  }
  0x11   : > { %189 = vst.msk [vmem:[#allocation2 + $0x78] sm:$0xff] %vm172_vm0, %v2404_v0  ;;  %190 = vst.msk [vmem:[#allocation2 + $0x80] sm:$0xff] %vm172_vm0, %v2404_v0  ;;  %v229_v3 = vld [vmem:[%s2513_s18 + $0x8] sm:$0xff]  ;;  %v232_v4 = vld [vmem:[%s2513_s18 + $0x20] sm:$0xff]  ;;  %s3491_s10 = scalar_lea.vmem %s3582_s3, %s2309_s15 }
  0x12   : > { %192 = vst.msk [vmem:[#allocation2 + $0x90] sm:$0xff] %vm172_vm0, %v2404_v0  ;;  %193 = vst.msk [vmem:[#allocation2 + $0x98] sm:$0xff] %vm172_vm0, %v2404_v0  ;;  %v231_v5 = vld [vmem:[%s2513_s18 + $0x18] sm:$0xff]  ;;  %v234_v6 = vld [vmem:[%s2513_s18 + $0x30] sm:$0xff] }
  0x13   : > { %195 = vst.msk [vmem:[#allocation2 + $0xa8] sm:$0xff] %vm172_vm0, %v2404_v0  ;;  %196 = vst.msk [vmem:[#allocation2 + $0xb0] sm:$0xff] %vm172_vm0, %v2404_v0  ;;  %v357_v7 = vld [vmem:[#allocation2 + $0x1] sm:$0xff]  ;;  %v235_v11 = vld [vmem:[%s2513_s18 + $0x38] sm:$0xff] }
  0x14   : > { %198 = vst.msk [vmem:[#allocation2 + $0xc0] sm:$0xff] %vm172_vm0, %v2404_v0  ;;  %199 = vst.msk [vmem:[#allocation2 + $0xc8] sm:$0xff] %vm172_vm0, %v2404_v0  ;;  %v233_v9 = vld [vmem:[%s2513_s18 + $0x28] sm:$0xff]  ;;  %421 = vrot.lane.b32.xlu0 %v357_v7, %s2405_s19  ;;  %v236_v10 = vld [vmem:[%s2513_s18 + $0x40] sm:$0xff] }
  0x15   : > { %201 = vst.msk [vmem:[#allocation2 + $0xd8] sm:$0xff] %vm172_vm0, %v2404_v0  ;;  %202 = vst.msk [vmem:[#allocation2 + $0xe0] sm:$0xff] %vm172_vm0, %v2404_v0  ;;  %v238_v12 = vld [vmem:[%s2513_s18 + $0x50] sm:$0xff]  ;;  %v237_v13 = vld [vmem:[%s2513_s18 + $0x48] sm:$0xff] }
  0x16   : > { %204 = vst.msk [vmem:[#allocation2 + $0xf0] sm:$0xff] %vm172_vm0, %v2404_v0  ;;  %205 = vst.msk [vmem:[#allocation2 + $0xf8] sm:$0xff] %vm172_vm0, %v2404_v0  ;;  %v240_v14 = vld [vmem:[%s2513_s18 + $0x60] sm:$0xff]  ;;  %v239_v15 = vld [vmem:[%s2513_s18 + $0x58] sm:$0xff] }
  0x17   : > { %207 = vst.msk [vmem:[#allocation2 + $0x108] sm:$0xff] %vm172_vm0, %v2404_v0  ;;  %208 = vst.msk [vmem:[#allocation2 + $0x110] sm:$0xff] %vm172_vm0, %v2404_v0  ;;  %v242_v16 = vld [vmem:[%s2513_s18 + $0x70] sm:$0xff]  ;;  %v241_v17 = vld [vmem:[%s2513_s18 + $0x68] sm:$0xff] }
  0x18   : > { %210 = vst.msk [vmem:[#allocation2 + $0x120] sm:$0xff] %vm172_vm0, %v2404_v0  ;;  %211 = vst.msk [vmem:[#allocation2 + $0x128] sm:$0xff] %vm172_vm0, %v2404_v0  ;;  %v244_v18 = vld [vmem:[%s2513_s18 + $0x80] sm:$0xff]  ;;  %v243_v19 = vld [vmem:[%s2513_s18 + $0x78] sm:$0xff] }
  0x19   : > { %213 = vst.msk [vmem:[#allocation2 + $0x138] sm:$0xff] %vm172_vm0, %v2404_v0  ;;  %214 = vst.msk [vmem:[#allocation2 + $0x140] sm:$0xff] %vm172_vm0, %v2404_v0  ;;  %v246_v20 = vld [vmem:[%s2513_s18 + $0x90] sm:$0xff]  ;;  %v245_v21 = vld [vmem:[%s2513_s18 + $0x88] sm:$0xff] }
  0x1a   : > { %216 = vst.msk [vmem:[#allocation2 + $0x150] sm:$0xff] %vm172_vm0, %v2404_v0  ;;  %217 = vst.msk [vmem:[#allocation2 + $0x158] sm:$0xff] %vm172_vm0, %v2404_v0  ;;  %v248_v22 = vld [vmem:[%s2513_s18 + $0xa0] sm:$0xff]  ;;  %v247_v23 = vld [vmem:[%s2513_s18 + $0x98] sm:$0xff] }
  0x1b   : > { %219 = vst.msk [vmem:[#allocation2 + $0x168] sm:$0xff] %vm172_vm0, %v2404_v0  ;;  %220 = vst.msk [vmem:[#allocation2 + $0x170] sm:$0xff] %vm172_vm0, %v2404_v0  ;;  %v250_v24 = vld [vmem:[%s2513_s18 + $0xb0] sm:$0xff]  ;;  %v249_v28 = vld [vmem:[%s2513_s18 + $0xa8] sm:$0xff] }
  0x1c   : > { %222 = vst.msk [vmem:[#allocation2 + $0x180] sm:$0xff] %vm172_vm0, %v2404_v0  ;;  %223 = vst.msk [vmem:[#allocation2 + $0x188] sm:$0xff] %vm172_vm0, %v2404_v0  ;;  %v252_v29 = vld [vmem:[%s2513_s18 + $0xc0] sm:$0xff]  ;;  %v251_v33 = vld [vmem:[%s2513_s18 + $0xb8] sm:$0xff] }
  0x1d   : > { %225 = vst.msk [vmem:[#allocation2 + $0x198] sm:$0xff] %vm172_vm0, %v2404_v0  ;;  %226 = vst.msk [vmem:[#allocation2 + $0x1a0] sm:$0xff] %vm172_vm0, %v2404_v0  ;;  %v254_v34 = vld [vmem:[%s2513_s18 + $0xd0] sm:$0xff]  ;;  %v253_v35 = vld [vmem:[%s2513_s18 + $0xc8] sm:$0xff] }
  0x1e   : > { %176 = vst.msk [vmem:[#allocation2 + $0x10] sm:$0x3] %vm175_vm1, %v2404_v0  ;;  %179 = vst.msk [vmem:[#allocation2 + $0x28] sm:$0x3] %vm175_vm1, %v2404_v0  ;;  %v256_v36 = vld [vmem:[%s2513_s18 + $0xe0] sm:$0xff]  ;;  %v255_v37 = vld [vmem:[%s2513_s18 + $0xd8] sm:$0xff] }
  0x1f   : > { %182 = vst.msk [vmem:[#allocation2 + $0x40] sm:$0x3] %vm175_vm1, %v2404_v0  ;;  %185 = vst.msk [vmem:[#allocation2 + $0x58] sm:$0x3] %vm175_vm1, %v2404_v0  ;;  %v257_v39 = vld [vmem:[%s2513_s18 + $0xe8] sm:$0xff]  ;;  %v293_v45 = vld [vmem:[#allocation2] sm:$0xff] }
  0x20   : > { %188 = vst.msk [vmem:[#allocation2 + $0x70] sm:$0x3] %vm175_vm1, %v2404_v0  ;;  %191 = vst.msk [vmem:[#allocation2 + $0x88] sm:$0x3] %vm175_vm1, %v2404_v0  ;;  %v294_v47 = vld [vmem:[#allocation2 + $0x8] sm:$0xff] }
  0x21   : > { %194 = vst.msk [vmem:[#allocation2 + $0xa0] sm:$0x3] %vm175_vm1, %v2404_v0  ;;  %197 = vst.msk [vmem:[#allocation2 + $0xb8] sm:$0x3] %vm175_vm1, %v2404_v0 }
  0x22   : > { %200 = vst.msk [vmem:[#allocation2 + $0xd0] sm:$0x3] %vm175_vm1, %v2404_v0  ;;  %203 = vst.msk [vmem:[#allocation2 + $0xe8] sm:$0x3] %vm175_vm1, %v2404_v0 }
  0x23   : > { %206 = vst.msk [vmem:[#allocation2 + $0x100] sm:$0x3] %vm175_vm1, %v2404_v0  ;;  %209 = vst.msk [vmem:[#allocation2 + $0x118] sm:$0x3] %vm175_vm1, %v2404_v0 }
  0x24   : > { %212 = vst.msk [vmem:[#allocation2 + $0x130] sm:$0x3] %vm175_vm1, %v2404_v0  ;;  %215 = vst.msk [vmem:[#allocation2 + $0x148] sm:$0x3] %vm175_vm1, %v2404_v0 }
  0x25   : > { %218 = vst.msk [vmem:[#allocation2 + $0x160] sm:$0x3] %vm175_vm1, %v2404_v0  ;;  %221 = vst.msk [vmem:[#allocation2 + $0x178] sm:$0x3] %vm175_vm1, %v2404_v0  ;;  %v358_v8 = vld [vmem:[#allocation2 + $0x9] sm:$0xff] }
  0x26   : > { %224 = vst.msk [vmem:[#allocation2 + $0x190] sm:$0x3] %vm175_vm1, %v2404_v0  ;;  %227 = vst.msk [vmem:[#allocation2 + $0x1a8] sm:$0x3] %vm175_vm1, %v2404_v0  ;;  %423 = vrot.lane.b32.xlu0 %v358_v8, %s2405_s19 }
  0x27   : > { %261 = vst.msk [vmem:[#allocation2 + $0x19] sm:$0xff] %vm172_vm0, %v228_v1  ;;  %263 = vst.msk [vmem:[#allocation2 + $0x31] sm:$0xff] %vm172_vm0, %v230_v2 }
  0x28   : > { %262 = vst.msk [vmem:[#allocation2 + $0x21] sm:$0xff] %vm172_vm0, %v229_v3  ;;  %265 = vst.msk [vmem:[#allocation2 + $0x49] sm:$0xff] %vm172_vm0, %v232_v4 }
  0x29   : > { %264 = vst.msk [vmem:[#allocation2 + $0x39] sm:$0xff] %vm172_vm0, %v231_v5  ;;  %267 = vst.msk [vmem:[#allocation2 + $0x61] sm:$0xff] %vm172_vm0, %v234_v6 }
  0x2a   : > { %266 = vst.msk [vmem:[#allocation2 + $0x51] sm:$0xff] %vm172_vm0, %v233_v9  ;;  %269 = vst.msk [vmem:[#allocation2 + $0x79] sm:$0xff] %vm172_vm0, %v236_v10 }
  0x2b   : > { %268 = vst.msk [vmem:[#allocation2 + $0x69] sm:$0xff] %vm172_vm0, %v235_v11  ;;  %271 = vst.msk [vmem:[#allocation2 + $0x91] sm:$0xff] %vm172_vm0, %v238_v12 }
  0x2c   : > { %270 = vst.msk [vmem:[#allocation2 + $0x81] sm:$0xff] %vm172_vm0, %v237_v13  ;;  %273 = vst.msk [vmem:[#allocation2 + $0xa9] sm:$0xff] %vm172_vm0, %v240_v14 }
  0x2d   : > { %272 = vst.msk [vmem:[#allocation2 + $0x99] sm:$0xff] %vm172_vm0, %v239_v15  ;;  %275 = vst.msk [vmem:[#allocation2 + $0xc1] sm:$0xff] %vm172_vm0, %v242_v16 }
  0x2e   : > { %274 = vst.msk [vmem:[#allocation2 + $0xb1] sm:$0xff] %vm172_vm0, %v241_v17  ;;  %277 = vst.msk [vmem:[#allocation2 + $0xd9] sm:$0xff] %vm172_vm0, %v244_v18  ;;  %v2558_v25 = vld [vmem:[#allocation2 + $0x19] sm:$0xff]  ;;  %v2560_v26 = vld [vmem:[#allocation2 + $0x31] sm:$0xff] }
  0x2f   : > { %276 = vst.msk [vmem:[#allocation2 + $0xc9] sm:$0xff] %vm172_vm0, %v243_v19  ;;  %279 = vst.msk [vmem:[#allocation2 + $0xf1] sm:$0xff] %vm172_vm0, %v246_v20  ;;  %425 = vrot.lane.b32.xlu1 %v2558_v25, %s2405_s19  ;;  %v2567_v27 = vld [vmem:[#allocation2 + $0x21] sm:$0xff]  ;;  %429 = vrot.lane.b32.xlu0 %v2560_v26, %s2405_s19  ;;  %v2575_v30 = vld [vmem:[#allocation2 + $0x49] sm:$0xff] }
  0x30   : > { %278 = vst.msk [vmem:[#allocation2 + $0xe1] sm:$0xff] %vm172_vm0, %v245_v21  ;;  %281 = vst.msk [vmem:[#allocation2 + $0x109] sm:$0xff] %vm172_vm0, %v248_v22  ;;  %v2579_v31 = vld [vmem:[#allocation2 + $0x39] sm:$0xff]  ;;  %v2583_v32 = vld [vmem:[#allocation2 + $0x61] sm:$0xff] }
  0x31   : > { %280 = vst.msk [vmem:[#allocation2 + $0xf9] sm:$0xff] %vm172_vm0, %v247_v23  ;;  %283 = vst.msk [vmem:[#allocation2 + $0x121] sm:$0xff] %vm172_vm0, %v250_v24  ;;  %v2595_v38 = vld [vmem:[#allocation2 + $0x51] sm:$0xff]  ;;  %v2603_v40 = vld [vmem:[#allocation2 + $0x79] sm:$0xff] }
  0x32   : > { %282 = vst.msk [vmem:[#allocation2 + $0x111] sm:$0xff] %vm172_vm0, %v249_v28  ;;  %285 = vst.msk [vmem:[#allocation2 + $0x139] sm:$0xff] %vm172_vm0, %v252_v29  ;;  %v2607_v41 = vld [vmem:[#allocation2 + $0x69] sm:$0xff]  ;;  %v2611_v42 = vld [vmem:[#allocation2 + $0x91] sm:$0xff] }
  0x33   : > { %427 = vrot.lane.b32.xlu1 %v2567_v27, %s2405_s19  ;;  %433 = vrot.lane.b32.xlu0 %v2575_v30, %s2405_s19  ;;  %284 = vst.msk [vmem:[#allocation2 + $0x129] sm:$0xff] %vm172_vm0, %v251_v33  ;;  %287 = vst.msk [vmem:[#allocation2 + $0x151] sm:$0xff] %vm172_vm0, %v254_v34  ;;  %v2615_v43 = vld [vmem:[#allocation2 + $0x81] sm:$0xff]  ;;  %v371_v44 = vld [vmem:[#allocation2 + $0xa9] sm:$0xff] }
  0x34   : > { %286 = vst.msk [vmem:[#allocation2 + $0x141] sm:$0xff] %vm172_vm0, %v253_v35  ;;  %289 = vst.msk [vmem:[#allocation2 + $0x169] sm:$0xff] %vm172_vm0, %v256_v36  ;;  %v370_v46 = vld [vmem:[#allocation2 + $0x99] sm:$0xff]  ;;  %v2628_v49 = vld [vmem:[#allocation2 + $0x30] sm:$0xff] }
  0x35   : > { %288 = vst.msk [vmem:[#allocation2 + $0x159] sm:$0xff] %vm172_vm0, %v255_v37  ;;  %290 = vst.msk [vmem:[#allocation2 + $0x171] sm:$0xff] %vm172_vm0, %v257_v39  ;;  %v2622_v48 = vld [vmem:[#allocation2 + $0x18] sm:$0xff]  ;;  %v2630_v50 = vld [vmem:[#allocation2 + $0x20] sm:$0xff] }
  0x36   : > { %325 = vst.msk [vmem:[#allocation3] sm:$0xff] %vm172_vm0, %v293_v45  ;;  %326 = vst.msk [vmem:[#allocation3 + $0x8] sm:$0xff] %vm172_vm0, %v294_v47  ;;  %v373_v51 = vld [vmem:[#allocation2 + $0xc1] sm:$0xff]  ;;  %v372_v53 = vld [vmem:[#allocation2 + $0xb1] sm:$0xff] }
  0x37   : > { %431 = vrot.lane.b32.xlu1 %v2579_v31, %s2405_s19  ;;  %437 = vrot.lane.b32.xlu0 %v2583_v32, %s2405_s19  ;;  %327 = vst.msk [vmem:[#allocation3 + $0x10] sm:$0xff] %vm172_vm0, %v2622_v48  ;;  %329 = vst.msk [vmem:[#allocation3 + $0x20] sm:$0xff] %vm172_vm0, %v2628_v49  ;;  %v2636_v52 = vld [vmem:[#allocation2 + $0x48] sm:$0xff]  ;;  %v2641_v54 = vld [vmem:[#allocation2 + $0x38] sm:$0xff] }
  0x38   : > { %328 = vst.msk [vmem:[#allocation3 + $0x18] sm:$0xff] %vm172_vm0, %v2630_v50  ;;  %331 = vst.msk [vmem:[#allocation3 + $0x30] sm:$0xff] %vm172_vm0, %v2636_v52  ;;  %v2643_v55 = vld [vmem:[#allocation2 + $0x60] sm:$0xff]  ;;  %v2651_v57 = vld [vmem:[#allocation2 + $0x50] sm:$0xff] }
  0x39   : > { %v2645_v56 = vld [vmem:[#allocation2 + $0xd9] sm:$0xff]  ;;  %330 = vst.msk [vmem:[#allocation3 + $0x28] sm:$0xff] %vm172_vm0, %v2641_v54  ;;  %333 = vst.msk [vmem:[#allocation3 + $0x40] sm:$0xff] %vm172_vm0, %v2643_v55  ;;  %v2655_v59 = vld [vmem:[#allocation2 + $0x68] sm:$0xff] }
  0x3a   : > { %v2653_v58 = vld [vmem:[#allocation2 + $0x78] sm:$0xff]  ;;  %332 = vst.msk [vmem:[#allocation3 + $0x38] sm:$0xff] %vm172_vm0, %v2651_v57  ;;  %334 = vst.msk [vmem:[#allocation3 + $0x48] sm:$0xff] %vm172_vm0, %v2655_v59  ;;  %v2664_v60 = vld [vmem:[#allocation2 + $0x90] sm:$0xff] }
  0x3b   : > { %435 = vrot.lane.b32.xlu1 %v2595_v38, %s2405_s19  ;;  %441 = vrot.lane.b32.xlu0 %v2603_v40, %s2405_s19  ;;  %335 = vst.msk [vmem:[#allocation3 + $0x50] sm:$0xff] %vm172_vm0, %v2653_v58  ;;  %v2666_v61 = vld [vmem:[#allocation2 + $0x80] sm:$0xff]  ;;  %v2668_v62 = vld [vmem:[#allocation2 + $0xa8] sm:$0xff]  ;;  %337 = vst.msk [vmem:[#allocation3 + $0x60] sm:$0xff] %vm172_vm0, %v2664_v60 }
  0x3c   : > { %v374_v63 = vld [vmem:[#allocation2 + $0xc9] sm:$0xff]  ;;  %336 = vst.msk [vmem:[#allocation3 + $0x58] sm:$0xff] %vm172_vm0, %v2666_v61  ;;  %339 = vst.msk [vmem:[#allocation3 + $0x70] sm:$0xff] %vm172_vm0, %v2668_v62  ;;  %v2676_v0 = vld [vmem:[#allocation2 + $0x98] sm:$0xff] }
  0x3d   : > { %v2678_v1 = vld [vmem:[#allocation2 + $0xc0] sm:$0xff]  ;;  %v2680_v2 = vld [vmem:[#allocation2 + $0xb0] sm:$0xff]  ;;  %338 = vst.msk [vmem:[#allocation3 + $0x68] sm:$0xff] %vm172_vm0, %v2676_v0  ;;  %v2689_v3 = vld [vmem:[#allocation2 + $0xd8] sm:$0xff] }
  0x3e   : > { %341 = vst.msk [vmem:[#allocation3 + $0x80] sm:$0xff] %vm172_vm0, %v2678_v1  ;;  %340 = vst.msk [vmem:[#allocation3 + $0x78] sm:$0xff] %vm172_vm0, %v2680_v2  ;;  %v2691_v4 = vld [vmem:[#allocation2 + $0xc8] sm:$0xff]  ;;  %v2693_v5 = vld [vmem:[#allocation2 + $0xf0] sm:$0xff] }
  0x3f   : > { %439 = vrot.lane.b32.xlu1 %v2607_v41, %s2405_s19  ;;  %445 = vrot.lane.b32.xlu0 %v2611_v42, %s2405_s19  ;;  %343 = vst.msk [vmem:[#allocation3 + $0x90] sm:$0xff] %vm172_vm0, %v2689_v3  ;;  %342 = vst.msk [vmem:[#allocation3 + $0x88] sm:$0xff] %vm172_vm0, %v2691_v4  ;;  %v2701_v6 = vld [vmem:[#allocation2 + $0xe0] sm:$0xff]  ;;  %v2703_v7 = vld [vmem:[#allocation2 + $0x108] sm:$0xff] }
  0x40   : > { %345 = vst.msk [vmem:[#allocation3 + $0xa0] sm:$0xff] %vm172_vm0, %v2693_v5  ;;  %v2705_v8 = vld [vmem:[#allocation2 + $0xf8] sm:$0xff]  ;;  %344 = vst.msk [vmem:[#allocation3 + $0x98] sm:$0xff] %vm172_vm0, %v2701_v6  ;;  %v2715_v9 = vld [vmem:[#allocation2 + $0x120] sm:$0xff] }
  0x41   : > { %347 = vst.msk [vmem:[#allocation3 + $0xb0] sm:$0xff] %vm172_vm0, %v2703_v7  ;;  %346 = vst.msk [vmem:[#allocation3 + $0xa8] sm:$0xff] %vm172_vm0, %v2705_v8  ;;  %v2717_v10 = vld [vmem:[#allocation2 + $0x110] sm:$0xff]  ;;  %v2726_v12 = vld [vmem:[#allocation2 + $0x138] sm:$0xff] }
  0x42   : > { %v2719_v11 = vld [vmem:[#allocation2 + $0xf1] sm:$0xff]  ;;  %349 = vst.msk [vmem:[#allocation3 + $0xc0] sm:$0xff] %vm172_vm0, %v2715_v9  ;;  %348 = vst.msk [vmem:[#allocation3 + $0xb8] sm:$0xff] %vm172_vm0, %v2717_v10  ;;  %v2728_v13 = vld [vmem:[#allocation2 + $0xe1] sm:$0xff] }
  0x43   : > { %443 = vrot.lane.b32.xlu1 %v2615_v43, %s2405_s19  ;;  %449 = vrot.lane.b32.xlu0 %v371_v44, %s2405_s19  ;;  %351 = vst.msk [vmem:[#allocation3 + $0xd0] sm:$0xff] %vm172_vm0, %v2726_v12  ;;  %v2732_v14 = vld [vmem:[#allocation2 + $0x128] sm:$0xff]  ;;  %v2742_v16 = vld [vmem:[#allocation2 + $0x150] sm:$0xff]  ;;  %v2744_v17 = vld [vmem:[#allocation2 + $0xf9] sm:$0xff] }
  0x44   : > { %350 = vst.msk [vmem:[#allocation3 + $0xc8] sm:$0xff] %vm172_vm0, %v2732_v14  ;;  %v2738_v15 = vld [vmem:[#allocation2 + $0x109] sm:$0xff]  ;;  %353 = vst.msk [vmem:[#allocation3 + $0xe0] sm:$0xff] %vm172_vm0, %v2742_v16  ;;  %v2748_v18 = vld [vmem:[#allocation2 + $0x140] sm:$0xff] }
  0x45   : > { %352 = vst.msk [vmem:[#allocation3 + $0xd8] sm:$0xff] %vm172_vm0, %v2748_v18  ;;  %v381_v19 = vld [vmem:[#allocation2 + $0x121] sm:$0xff]  ;;  %v2758_v21 = vld [vmem:[#allocation2 + $0x111] sm:$0xff]  ;;  %v383_v23 = vld [vmem:[#allocation2 + $0x139] sm:$0xff] }
  0x46   : > { %v2756_v20 = vld [vmem:[#allocation2 + $0x168] sm:$0xff]  ;;  %v2762_v22 = vld [vmem:[#allocation2 + $0x158] sm:$0xff]  ;;  %v2771_v28 = vld [vmem:[#allocation2 + $0x170] sm:$0xff] }
  0x47   : > { %447 = vrot.lane.b32.xlu1 %v370_v46, %s2405_s19  ;;  %453 = vrot.lane.b32.xlu0 %v373_v51, %s2405_s19  ;;  %355 = vst.msk [vmem:[#allocation3 + $0xf0] sm:$0xff] %vm172_vm0, %v2756_v20  ;;  %354 = vst.msk [vmem:[#allocation3 + $0xe8] sm:$0xff] %vm172_vm0, %v2762_v22  ;;  %v2769_v24 = vld [vmem:[#allocation2 + $0x129] sm:$0xff]  ;;  %v385_v29 = vld [vmem:[#allocation2 + $0x151] sm:$0xff] }
  0x48   : > { %3597 = vst [vmem:[#allocation4_spill] sm:$0xff] %v2769_v24  ;;  %356 = vst.msk [vmem:[#allocation3 + $0xf8] sm:$0xff] %vm172_vm0, %v2771_v28  ;;  %v258_v33 = vld [vmem:[%s2513_s18 + $0xf0] sm:$0xff]  ;;  %v384_v34 = vld [vmem:[#allocation2 + $0x141] sm:$0xff] }
  0x49   : > { %291 = vst.msk [vmem:[#allocation2 + $0x181] sm:$0xff] %vm172_vm0, %v258_v33  ;;  %v387_v35 = vld [vmem:[#allocation2 + $0x169] sm:$0xff]  ;;  %v259_v36 = vld [vmem:[%s2513_s18 + $0xf8] sm:$0xff] }
  0x4a   : > { %292 = vst.msk [vmem:[#allocation2 + $0x189] sm:$0xff] %vm172_vm0, %v259_v36  ;;  %v386_v37 = vld [vmem:[#allocation2 + $0x159] sm:$0xff]  ;;  %v550_v39 = vld [vmem:[#allocation2 + $0x2] sm:$0xff]  ;;  %v388_v44 = vld [vmem:[#allocation2 + $0x171] sm:$0xff] }
  0x4b   : > { %451 = vrot.lane.b32.xlu1 %v372_v53, %s2405_s19  ;;  %457 = vrot.lane.b32.xlu0 %v2645_v56, %s2405_s19  ;;  %v2787_v45 = vld [vmem:[#allocation2 + $0x1a] sm:$0xff]  ;;  %v551_v46 = vld [vmem:[#allocation2 + $0xa] sm:$0xff]  ;;  %v2792_v47 = vld [vmem:[#allocation2 + $0x32] sm:$0xff] }
  0x4c   : > { %v2795_v51 = vld [vmem:[#allocation2 + $0x22] sm:$0xff]  ;;  %v2799_v53 = vld [vmem:[#allocation2 + $0x4a] sm:$0xff] }
  0x4d   : > { %3598 = vst [vmem:[#allocation5_spill] sm:$0xff] %v2799_v53  ;;  %v2817_v33 = vld [vmem:[#allocation2 + $0x6a] sm:$0xff] }
  0x4e   : > { %3601 = vst [vmem:[#allocation8_spill] sm:$0xff] %v2817_v33  ;;  %v564_v36 = vld [vmem:[#allocation2 + $0xaa] sm:$0xff] }
  0x4f   : > { %455 = vrot.lane.b32.xlu1 %v374_v63, %s2405_s19  ;;  %461 = vrot.lane.b32.xlu0 %v2719_v11, %s2405_s19  ;;  %v2803_v63 = vld [vmem:[#allocation2 + $0x3a] sm:$0xff] }
  0x53   : > { %459 = vrot.lane.b32.xlu1 %v2728_v13, %s2405_s19  ;;  %465 = vrot.lane.b32.xlu0 %v2738_v15, %s2405_s19 }
  0x57   : > { %463 = vrot.lane.b32.xlu1 %v2744_v17, %s2405_s19  ;;  %469 = vrot.lane.b32.xlu0 %v381_v19, %s2405_s19  ;;  %v2807_v19 = vld [vmem:[#allocation2 + $0x62] sm:$0xff] }
  0x58   : > { %3599 = vst [vmem:[#allocation6_spill] sm:$0xff] %v2807_v19 }
  0x5b   : > { %467 = vrot.lane.b32.xlu1 %v2758_v21, %s2405_s19  ;;  %473 = vrot.lane.b32.xlu0 %v383_v23, %s2405_s19  ;;  %v2811_v23 = vld [vmem:[#allocation2 + $0x52] sm:$0xff] }
  0x5c   : > { %3600 = vst [vmem:[#allocation7_spill] sm:$0xff] %v2811_v23 }
  0x5f   : > { %471 = vrot.lane.b32.xlu1 %v2769_v24, %s2405_s19  ;;  %477 = vrot.lane.b32.xlu0 %v385_v29, %s2405_s19  ;;  %v560_v29 = vld [vmem:[#allocation2 + $0x7a] sm:$0xff]  ;;  %v578_v24 = vld [vmem:[#allocation2 + $0x152] sm:$0xff] }
  0x63   : > { %475 = vrot.lane.b32.xlu1 %v384_v34, %s2405_s19  ;;  %481 = vrot.lane.b32.xlu0 %v387_v35, %s2405_s19  ;;  %v562_v34 = vld [vmem:[#allocation2 + $0x92] sm:$0xff]  ;;  %v561_v35 = vld [vmem:[#allocation2 + $0x82] sm:$0xff] }
  0x67   : > { %479 = vrot.lane.b32.xlu1 %v386_v37, %s2405_s19  ;;  %614 = vrot.lane.b32.xlu0 %v550_v39, %s2406_s20  ;;  %v563_v37 = vld [vmem:[#allocation2 + $0x9a] sm:$0xff]  ;;  %v566_v39 = vld [vmem:[#allocation2 + $0xc2] sm:$0xff] }
  0x6b   : > { %483 = vrot.lane.b32.xlu1 %v388_v44, %s2405_s19  ;;  %618 = vrot.lane.b32.xlu0 %v2787_v45, %s2406_s20  ;;  %v565_v44 = vld [vmem:[#allocation2 + $0xb2] sm:$0xff] }
  0x6f   : > { %616 = vrot.lane.b32.xlu1 %v551_v46, %s2406_s20  ;;  %622 = vrot.lane.b32.xlu0 %v2792_v47, %s2406_s20  ;;  %v2827_v46 = vld [vmem:[#allocation2 + $0xda] sm:$0xff] }
  0x73   : > { %620 = vrot.lane.b32.xlu1 %v2795_v51, %s2406_s20  ;;  %626 = vrot.lane.b32.xlu0 %v2799_v53, %s2406_s20 }
  0x77   : > { %624 = vrot.lane.b32.xlu1 %v2803_v63, %s2406_s20  ;;  %630 = vrot.lane.b32.xlu0 %v2807_v19, %s2406_s20 }
  0x7b   : > { %628 = vrot.lane.b32.xlu1 %v2811_v23, %s2406_s20  ;;  %634 = vrot.lane.b32.xlu0 %v560_v29, %s2406_s20  ;;  %v567_v29 = vld [vmem:[#allocation2 + $0xca] sm:$0xff] }
  0x7f   : > { %632 = vrot.lane.b32.xlu1 %v2817_v33, %s2406_s20  ;;  %638 = vrot.lane.b32.xlu0 %v562_v34, %s2406_s20  ;;  %v2832_v34 = vld [vmem:[#allocation2 + $0xf2] sm:$0xff]  ;;  %v2858_v33 = vld [vmem:[#allocation2 + $0x12a] sm:$0xff] }
  0x80   : > { %3605 = vst [vmem:[#allocation12_spill] sm:$0xff] %v2858_v33 }
  0x83   : > { %636 = vrot.lane.b32.xlu1 %v561_v35, %s2406_s20  ;;  %642 = vrot.lane.b32.xlu0 %v564_v36, %s2406_s20  ;;  %v2835_v35 = vld [vmem:[#allocation2 + $0xe2] sm:$0xff]  ;;  %v2839_v36 = vld [vmem:[#allocation2 + $0x10a] sm:$0xff] }
  0x84   : > { %3602 = vst [vmem:[#allocation9_spill] sm:$0xff] %v2839_v36 }
  0x86   : > { %v422_v19 = vpop.permute.xlu0 %421 }
  0x87   : > { %640 = vrot.lane.b32.xlu1 %v563_v37, %s2406_s20  ;;  %646 = vrot.lane.b32.xlu0 %v566_v39, %s2406_s20  ;;  %v2843_v37 = vld [vmem:[#allocation2 + $0xfa] sm:$0xff]  ;;  %v2847_v39 = vld [vmem:[#allocation2 + $0x122] sm:$0xff]  ;;  %518 = vst.msk [vmem:[#allocation3] sm:$0xff] %vm517_vm2, %v422_v19 }
  0x88   : > { %3603 = vst [vmem:[#allocation10_spill] sm:$0xff] %v2847_v39 }
  0x8b   : > { %644 = vrot.lane.b32.xlu1 %v565_v44, %s2406_s20  ;;  %650 = vrot.lane.b32.xlu0 %v2827_v46, %s2406_s20  ;;  %v2851_v44 = vld [vmem:[#allocation2 + $0x112] sm:$0xff] }
  0x8c   : > { %3604 = vst [vmem:[#allocation11_spill] sm:$0xff] %v2851_v44 }
  0x8f   : > { %648 = vrot.lane.b32.xlu1 %v567_v29, %s2406_s20  ;;  %654 = vrot.lane.b32.xlu0 %v2832_v34, %s2406_s20  ;;  %v576_v29 = vld [vmem:[#allocation2 + $0x13a] sm:$0xff] }
  0x93   : > { %652 = vrot.lane.b32.xlu1 %v2835_v35, %s2406_s20  ;;  %658 = vrot.lane.b32.xlu0 %v2839_v36, %s2406_s20 }
  0x97   : > { %656 = vrot.lane.b32.xlu1 %v2843_v37, %s2406_s20  ;;  %662 = vrot.lane.b32.xlu0 %v2847_v39, %s2406_s20  ;;  %v577_v39 = vld [vmem:[#allocation2 + $0x142] sm:$0xff] }
  0x98   : > { %v424_v36 = vpop.permute.xlu0 %423 }
  0x99   : > { %519 = vst.msk [vmem:[#allocation3 + $0x8] sm:$0xff] %vm517_vm2, %v424_v36 }
  0x9b   : > { %660 = vrot.lane.b32.xlu1 %v2851_v44, %s2406_s20  ;;  %666 = vrot.lane.b32.xlu0 %v576_v29, %s2406_s20  ;;  %v580_v44 = vld [vmem:[#allocation2 + $0x16a] sm:$0xff]  ;;  %v579_v29 = vld [vmem:[#allocation2 + $0x15a] sm:$0xff] }
  0x9f   : > { %664 = vrot.lane.b32.xlu1 %v2858_v33, %s2406_s20  ;;  %670 = vrot.lane.b32.xlu0 %v578_v24, %s2406_s20  ;;  %v581_v24 = vld [vmem:[#allocation2 + $0x172] sm:$0xff] }
  0xa1   : > { %v426_v53 = vpop.permute.xlu1 %425  ;;  %v430_v19 = vpop.permute.xlu0 %429 }
  0xa2   : > { %520 = vst.msk [vmem:[#allocation3 + $0x10] sm:$0xff] %vm517_vm2, %v426_v53  ;;  %522 = vst.msk [vmem:[#allocation3 + $0x20] sm:$0xff] %vm517_vm2, %v430_v19 }
  0xa3   : > { %668 = vrot.lane.b32.xlu1 %v577_v39, %s2406_s20  ;;  %674 = vrot.lane.b32.xlu0 %v580_v44, %s2406_s20 }
  0xa5   : > { %v428_v23 = vpop.permute.xlu1 %427  ;;  %v434_v36 = vpop.permute.xlu0 %433 }
  0xa6   : > { %521 = vst.msk [vmem:[#allocation3 + $0x18] sm:$0xff] %vm517_vm2, %v428_v23  ;;  %524 = vst.msk [vmem:[#allocation3 + $0x30] sm:$0xff] %vm517_vm2, %v434_v36 }
  0xa7   : > { %672 = vrot.lane.b32.xlu1 %v579_v29, %s2406_s20  ;;  %807 = vrot.lane.b32.xlu0 %v2622_v48, %s2407_s21 }
  0xa9   : > { %v432_v33 = vpop.permute.xlu1 %431  ;;  %v438_v53 = vpop.permute.xlu0 %437 }
  0xaa   : > { %523 = vst.msk [vmem:[#allocation3 + $0x28] sm:$0xff] %vm517_vm2, %v432_v33  ;;  %526 = vst.msk [vmem:[#allocation3 + $0x40] sm:$0xff] %vm517_vm2, %v438_v53 }
  0xab   : > { %676 = vrot.lane.b32.xlu1 %v581_v24, %s2406_s20  ;;  %811 = vrot.lane.b32.xlu0 %v2628_v49, %s2407_s21 }
  0xad   : > { %v436_v39 = vpop.permute.xlu1 %435  ;;  %v442_v23 = vpop.permute.xlu0 %441 }
  0xae   : > { %525 = vst.msk [vmem:[#allocation3 + $0x38] sm:$0xff] %vm517_vm2, %v436_v39  ;;  %528 = vst.msk [vmem:[#allocation3 + $0x50] sm:$0xff] %vm517_vm2, %v442_v23 }
  0xaf   : > { %809 = vrot.lane.b32.xlu1 %v2630_v50, %s2407_s21  ;;  %815 = vrot.lane.b32.xlu0 %v2636_v52, %s2407_s21 }
  0xb1   : > { %v440_v48 = vpop.permute.xlu1 %439  ;;  %v446_v33 = vpop.permute.xlu0 %445 }
  0xb2   : > { %527 = vst.msk [vmem:[#allocation3 + $0x48] sm:$0xff] %vm517_vm2, %v440_v48  ;;  %530 = vst.msk [vmem:[#allocation3 + $0x60] sm:$0xff] %vm517_vm2, %v446_v33 }
  0xb3   : > { %813 = vrot.lane.b32.xlu1 %v2641_v54, %s2407_s21  ;;  %819 = vrot.lane.b32.xlu0 %v2643_v55, %s2407_s21 }
  0xb5   : > { %v444_v44 = vpop.permute.xlu1 %443  ;;  %v450_v50 = vpop.permute.xlu0 %449 }
  0xb6   : > { %529 = vst.msk [vmem:[#allocation3 + $0x58] sm:$0xff] %vm517_vm2, %v444_v44  ;;  %532 = vst.msk [vmem:[#allocation3 + $0x70] sm:$0xff] %vm517_vm2, %v450_v50 }
  0xb7   : > { %817 = vrot.lane.b32.xlu1 %v2651_v57, %s2407_s21  ;;  %823 = vrot.lane.b32.xlu0 %v2653_v58, %s2407_s21 }
  0xb9   : > { %v448_v19 = vpop.permute.xlu1 %447  ;;  %v454_v29 = vpop.permute.xlu0 %453 }
  0xba   : > { %531 = vst.msk [vmem:[#allocation3 + $0x68] sm:$0xff] %vm517_vm2, %v448_v19  ;;  %534 = vst.msk [vmem:[#allocation3 + $0x80] sm:$0xff] %vm517_vm2, %v454_v29 }
  0xbb   : > { %821 = vrot.lane.b32.xlu1 %v2655_v59, %s2407_s21  ;;  %827 = vrot.lane.b32.xlu0 %v2664_v60, %s2407_s21 }
  0xbd   : > { %v452_v36 = vpop.permute.xlu1 %451  ;;  %v458_v24 = vpop.permute.xlu0 %457 }
  0xbe   : > { %533 = vst.msk [vmem:[#allocation3 + $0x78] sm:$0xff] %vm517_vm2, %v452_v36  ;;  %536 = vst.msk [vmem:[#allocation3 + $0x90] sm:$0xff] %vm517_vm2, %v458_v24  ;;  %v773_v36 = vld [vmem:[#allocation2 + $0x180] sm:$0xff] }
  0xbf   : > { %825 = vrot.lane.b32.xlu1 %v2666_v61, %s2407_s21  ;;  %831 = vrot.lane.b32.xlu0 %v2668_v62, %s2407_s21 }
  0xc1   : > { %v456_v53 = vpop.permute.xlu1 %455  ;;  %v462_v39 = vpop.permute.xlu0 %461 }
  0xc2   : > { %535 = vst.msk [vmem:[#allocation3 + $0x88] sm:$0xff] %vm517_vm2, %v456_v53  ;;  %538 = vst.msk [vmem:[#allocation3 + $0xa0] sm:$0xff] %vm517_vm2, %v462_v39 }
  0xc3   : > { %829 = vrot.lane.b32.xlu1 %v2676_v0, %s2407_s21  ;;  %835 = vrot.lane.b32.xlu0 %v2678_v1, %s2407_s21 }
  0xc5   : > { %v460_v60 = vpop.permute.xlu1 %459  ;;  %v466_v23 = vpop.permute.xlu0 %465 }
  0xc6   : > { %537 = vst.msk [vmem:[#allocation3 + $0x98] sm:$0xff] %vm517_vm2, %v460_v60  ;;  %540 = vst.msk [vmem:[#allocation3 + $0xb0] sm:$0xff] %vm517_vm2, %v466_v23  ;;  %v774_v60 = vld [vmem:[#allocation2 + $0x188] sm:$0xff] }
  0xc7   : > { %833 = vrot.lane.b32.xlu1 %v2680_v2, %s2407_s21  ;;  %839 = vrot.lane.b32.xlu0 %v2689_v3, %s2407_s21 }
  0xc9   : > { %v464_v62 = vpop.permute.xlu1 %463  ;;  %v470_v0 = vpop.permute.xlu0 %469 }
  0xca   : > { %539 = vst.msk [vmem:[#allocation3 + $0xa8] sm:$0xff] %vm517_vm2, %v464_v62  ;;  %542 = vst.msk [vmem:[#allocation3 + $0xc0] sm:$0xff] %vm517_vm2, %v470_v0 }
  0xcb   : > { %837 = vrot.lane.b32.xlu1 %v2691_v4, %s2407_s21  ;;  %843 = vrot.lane.b32.xlu0 %v2693_v5, %s2407_s21 }
  0xcd   : > { %v468_v1 = vpop.permute.xlu1 %467  ;;  %v474_v2 = vpop.permute.xlu0 %473 }
  0xce   : > { %541 = vst.msk [vmem:[#allocation3 + $0xb8] sm:$0xff] %vm517_vm2, %v468_v1  ;;  %544 = vst.msk [vmem:[#allocation3 + $0xd0] sm:$0xff] %vm517_vm2, %v474_v2 }
  0xcf   : > { %841 = vrot.lane.b32.xlu1 %v2701_v6, %s2407_s21  ;;  %847 = vrot.lane.b32.xlu0 %v2703_v7, %s2407_s21 }
  0xd1   : > { %v472_v3 = vpop.permute.xlu1 %471  ;;  %v478_v4 = vpop.permute.xlu0 %477 }
  0xd2   : > { %543 = vst.msk [vmem:[#allocation3 + $0xc8] sm:$0xff] %vm517_vm2, %v472_v3  ;;  %546 = vst.msk [vmem:[#allocation3 + $0xe0] sm:$0xff] %vm517_vm2, %v478_v4 }
  0xd3   : > { %845 = vrot.lane.b32.xlu1 %v2705_v8, %s2407_s21  ;;  %851 = vrot.lane.b32.xlu0 %v2715_v9, %s2407_s21 }
  0xd5   : > { %v476_v48 = vpop.permute.xlu1 %475  ;;  %v482_v6 = vpop.permute.xlu0 %481 }
  0xd6   : > { %545 = vst.msk [vmem:[#allocation3 + $0xd8] sm:$0xff] %vm517_vm2, %v476_v48  ;;  %548 = vst.msk [vmem:[#allocation3 + $0xf0] sm:$0xff] %vm517_vm2, %v482_v6 }
  0xd7   : > { %849 = vrot.lane.b32.xlu1 %v2717_v10, %s2407_s21  ;;  %855 = vrot.lane.b32.xlu0 %v2726_v12, %s2407_s21 }
  0xd9   : > { %v480_v33 = vpop.permute.xlu1 %479  ;;  %v615_v44 = vpop.permute.xlu0 %614 }
  0xda   : > { %547 = vst.msk [vmem:[#allocation3 + $0xe8] sm:$0xff] %vm517_vm2, %v480_v33 }
  0xdb   : > { %853 = vrot.lane.b32.xlu1 %v2732_v14, %s2407_s21  ;;  %711 = vst.msk [vmem:[#allocation3] sm:$0xff] %vm710_vm3, %v615_v44  ;;  %859 = vrot.lane.b32.xlu0 %v2742_v16, %s2407_s21 }
  0xdd   : > { %v484_v50 = vpop.permute.xlu1 %483  ;;  %v619_v19 = vpop.permute.xlu0 %618 }
  0xde   : > { %549 = vst.msk [vmem:[#allocation3 + $0xf8] sm:$0xff] %vm517_vm2, %v484_v50 }
  0xdf   : > { %857 = vrot.lane.b32.xlu1 %v2748_v18, %s2407_s21  ;;  %713 = vst.msk [vmem:[#allocation3 + $0x10] sm:$0xff] %vm710_vm3, %v619_v19  ;;  %863 = vrot.lane.b32.xlu0 %v2756_v20, %s2407_s21 }
  0xe1   : > { %v617_v29 = vpop.permute.xlu1 %616  ;;  %v623_v24 = vpop.permute.xlu0 %622 }
  0xe2   : > { %712 = vst.msk [vmem:[#allocation3 + $0x8] sm:$0xff] %vm710_vm3, %v617_v29  ;;  %715 = vst.msk [vmem:[#allocation3 + $0x20] sm:$0xff] %vm710_vm3, %v623_v24  ;;  %v2393_v24 = vld [vmem:[%s3580_s1 + $0x10] ss:$0 sps:$4 sm:$0x33]  }
  0xe3   : > { %861 = vrot.lane.b32.xlu1 %v2762_v22, %s2407_s21  ;;  %867 = vrot.lane.b32.xlu0 %v773_v36, %s2407_s21 }
  0xe4   : > { %2374 = vmatprep.subr.msk.bf16.mxu0 %vm2026_vm5, %v2393_v24  ;;  %2375 = vmatprep.subr.msk.bf16.mxu1 %vm2026_vm5, %v2393_v24 }
  0xe5   : > { %v621_v53 = vpop.permute.xlu1 %620  ;;  %v627_v39 = vpop.permute.xlu0 %626 }
  0xe6   : > { %714 = vst.msk [vmem:[#allocation3 + $0x18] sm:$0xff] %vm710_vm3, %v621_v53  ;;  %717 = vst.msk [vmem:[#allocation3 + $0x30] sm:$0xff] %vm710_vm3, %v627_v39  ;;  %v2394_v39 = vld [vmem:[%s3580_s1 + $0x8] sm:$0xff]  }
  0xe7   : > { %865 = vrot.lane.b32.xlu1 %v2771_v28, %s2407_s21  ;;  %1000 = vrot.lane.b32.xlu0 %v2558_v25, %s2408_s22 }
  0xe9   : > { %v625_v23 = vpop.permute.xlu1 %624  ;;  %v631_v62 = vpop.permute.xlu0 %630 }
  0xea   : > { %716 = vst.msk [vmem:[#allocation3 + $0x28] sm:$0xff] %vm710_vm3, %v625_v23  ;;  %719 = vst.msk [vmem:[#allocation3 + $0x40] sm:$0xff] %vm710_vm3, %v631_v62  ;;  %v2395_v62 = vld [vmem:[%s3580_s1] sm:$0xff]  }
  0xeb   : > { %869 = vrot.lane.b32.xlu1 %v774_v60, %s2407_s21  ;;  %1004 = vrot.lane.b32.xlu0 %v2560_v26, %s2408_s22 }
  0xed   : > { %v629_v0 = vpop.permute.xlu1 %628  ;;  %v635_v1 = vpop.permute.xlu0 %634 }
  0xee   : > { %718 = vst.msk [vmem:[#allocation3 + $0x38] sm:$0xff] %vm710_vm3, %v629_v0  ;;  %721 = vst.msk [vmem:[#allocation3 + $0x50] sm:$0xff] %vm710_vm3, %v635_v1  ;;  %v3606_v1 = vld [vmem:[#allocation7_spill] sm:$0xff] }
  0xef   : > { %1002 = vrot.lane.b32.xlu1 %v2567_v27, %s2408_s22  ;;  %1008 = vrot.lane.b32.xlu0 %v2575_v30, %s2408_s22 }
  0xf1   : > { %v633_v25 = vpop.permute.xlu1 %632  ;;  %v639_v2 = vpop.permute.xlu0 %638 }
  0xf2   : > { %720 = vst.msk [vmem:[#allocation3 + $0x48] sm:$0xff] %vm710_vm3, %v633_v25  ;;  %723 = vst.msk [vmem:[#allocation3 + $0x60] sm:$0xff] %vm710_vm3, %v639_v2  ;;  %v3607_v25 = vld [vmem:[#allocation5_spill] sm:$0xff] }
  0xf3   : > { %1006 = vrot.lane.b32.xlu1 %v2579_v31, %s2408_s22  ;;  %1012 = vrot.lane.b32.xlu0 %v2583_v32, %s2408_s22 }
  0xf5   : > { %v637_v26 = vpop.permute.xlu1 %636  ;;  %v643_v27 = vpop.permute.xlu0 %642 }
  0xf6   : > { %722 = vst.msk [vmem:[#allocation3 + $0x58] sm:$0xff] %vm710_vm3, %v637_v26  ;;  %725 = vst.msk [vmem:[#allocation3 + $0x70] sm:$0xff] %vm710_vm3, %v643_v27  ;;  %v3608_v26 = vld [vmem:[#allocation11_spill] sm:$0xff] }
  0xf7   : > { %1010 = vrot.lane.b32.xlu1 %v2595_v38, %s2408_s22  ;;  %1016 = vrot.lane.b32.xlu0 %v2603_v40, %s2408_s22 }
  0xf9   : > { %v641_v30 = vpop.permute.xlu1 %640  ;;  %v647_v3 = vpop.permute.xlu0 %646 }
  0xfa   : > { %724 = vst.msk [vmem:[#allocation3 + $0x68] sm:$0xff] %vm710_vm3, %v641_v30  ;;  %727 = vst.msk [vmem:[#allocation3 + $0x80] sm:$0xff] %vm710_vm3, %v647_v3  ;;  %v956_v30 = vld [vmem:[#allocation2 + $0x109] sm:$0xff] }
  0xfb   : > { %1014 = vrot.lane.b32.xlu1 %v2607_v41, %s2408_s22  ;;  %1020 = vrot.lane.b32.xlu0 %v2611_v42, %s2408_s22 }
  0xfd   : > { %v645_v32 = vpop.permute.xlu1 %644  ;;  %v651_v38 = vpop.permute.xlu0 %650 }
  0xfe   : > { %726 = vst.msk [vmem:[#allocation3 + $0x78] sm:$0xff] %vm710_vm3, %v645_v32  ;;  %729 = vst.msk [vmem:[#allocation3 + $0x90] sm:$0xff] %vm710_vm3, %v651_v38  ;;  %v3120_v38 = vld [vmem:[#allocation2 + $0x121] sm:$0xff] }
  0xff   : > { %1018 = vrot.lane.b32.xlu1 %v2615_v43, %s2408_s22  ;;  %1034 = vrot.lane.b32.xlu0 %v2728_v13, %s2408_s22 }
 0x101   : > { %v649_v40 = vpop.permute.xlu1 %648  ;;  %v655_v41 = vpop.permute.xlu0 %654 }
 0x102   : > { %728 = vst.msk [vmem:[#allocation3 + $0x88] sm:$0xff] %vm710_vm3, %v649_v40  ;;  %731 = vst.msk [vmem:[#allocation3 + $0xa0] sm:$0xff] %vm710_vm3, %v655_v41  ;;  %v3610_v41 = vld [vmem:[#allocation4_spill] sm:$0xff] }
 0x103   : > { %1032 = vrot.lane.b32.xlu1 %v2645_v56, %s2408_s22  ;;  %1038 = vrot.lane.b32.xlu0 %v2744_v17, %s2408_s22 }
 0x105   : > { %v653_v42 = vpop.permute.xlu1 %652  ;;  %v659_v43 = vpop.permute.xlu0 %658 }
 0x106   : > { %730 = vst.msk [vmem:[#allocation3 + $0x98] sm:$0xff] %vm710_vm3, %v653_v42  ;;  %733 = vst.msk [vmem:[#allocation3 + $0xb0] sm:$0xff] %vm710_vm3, %v659_v43 }
 0x107   : > { %1036 = vrot.lane.b32.xlu1 %v2719_v11, %s2408_s22  ;;  %1195 = vrot.lane.b32.xlu0 %v2795_v51, %s2409_s23 }
 0x109   : > { %v657_v13 = vpop.permute.xlu1 %656  ;;  %v663_v56 = vpop.permute.xlu0 %662 }
 0x10a   : > { %732 = vst.msk [vmem:[#allocation3 + $0xa8] sm:$0xff] %vm710_vm3, %v657_v13  ;;  %735 = vst.msk [vmem:[#allocation3 + $0xc0] sm:$0xff] %vm710_vm3, %v663_v56 }
 0x10b   : > { %1193 = vrot.lane.b32.xlu1 %v2787_v45, %s2409_s23  ;;  %1227 = vrot.lane.b32.xlu0 %v2835_v35, %s2409_s23 }
 0x10d   : > { %v661_v4 = vpop.permute.xlu1 %660  ;;  %v667_v48 = vpop.permute.xlu0 %666 }
 0x10e   : > { %734 = vst.msk [vmem:[#allocation3 + $0xb8] sm:$0xff] %vm710_vm3, %v661_v4  ;;  %737 = vst.msk [vmem:[#allocation3 + $0xd0] sm:$0xff] %vm710_vm3, %v667_v48  ;;  %v3611_v48 = vld [vmem:[#allocation8_spill] sm:$0xff] }
 0x10f   : > { %1225 = vrot.lane.b32.xlu1 %v2827_v46, %s2409_s23  ;;  %1199 = vrot.lane.b32.xlu0 %v2803_v63, %s2409_s23 }
 0x111   : > { %v665_v51 = vpop.permute.xlu1 %664  ;;  %v671_v45 = vpop.permute.xlu0 %670 }
 0x112   : > { %736 = vst.msk [vmem:[#allocation3 + $0xc8] sm:$0xff] %vm710_vm3, %v665_v51  ;;  %739 = vst.msk [vmem:[#allocation3 + $0xe0] sm:$0xff] %vm710_vm3, %v671_v45  ;;  %v3612_v51 = vld [vmem:[#allocation6_spill] sm:$0xff] }
 0x113   : > { %1197 = vrot.lane.b32.xlu1 %v2792_v47, %s2409_s23  ;;  %1231 = vrot.lane.b32.xlu0 %v2843_v37, %s2409_s23 }
 0x115   : > { %v669_v35 = vpop.permute.xlu1 %668  ;;  %v675_v46 = vpop.permute.xlu0 %674 }
 0x116   : > { %738 = vst.msk [vmem:[#allocation3 + $0xd8] sm:$0xff] %vm710_vm3, %v669_v35  ;;  %741 = vst.msk [vmem:[#allocation3 + $0xf0] sm:$0xff] %vm710_vm3, %v675_v46  ;;  %v3613_v46 = vld [vmem:[#allocation12_spill] sm:$0xff] }
 0x117   : > { %1229 = vrot.lane.b32.xlu1 %v2832_v34, %s2409_s23  ;;  %1389 = vrot.lane.b32.xlu0 %v2641_v54, %s2410_s24 }
 0x119   : > { %v673_v6 = vpop.permute.xlu1 %672  ;;  %v808_v33 = vpop.permute.xlu0 %807 }
 0x11a   : > { %740 = vst.msk [vmem:[#allocation3 + $0xe8] sm:$0xff] %vm710_vm3, %v673_v6  ;;  %v3614_v6 = vld [vmem:[#allocation10_spill] sm:$0xff] }
 0x11b   : > { %1387 = vrot.lane.b32.xlu1 %v2628_v49, %s2410_s24  ;;  %904 = vst.msk [vmem:[#allocation3] sm:$0xff] %vm903_vm4, %v808_v33  ;;  %1421 = vrot.lane.b32.xlu0 %v2705_v8, %s2410_s24 }
 0x11d   : > { %v677_v44 = vpop.permute.xlu1 %676  ;;  %v812_v50 = vpop.permute.xlu0 %811 }
 0x11e   : > { %742 = vst.msk [vmem:[#allocation3 + $0xf8] sm:$0xff] %vm710_vm3, %v677_v44 }
 0x11f   : > { %1419 = vrot.lane.b32.xlu1 %v2693_v5, %s2410_s24  ;;  %906 = vst.msk [vmem:[#allocation3 + $0x10] sm:$0xff] %vm903_vm4, %v812_v50  ;;  %1393 = vrot.lane.b32.xlu0 %v2651_v57, %s2410_s24  ;;  %v1516_v57 = vld [vmem:[#allocation2 + $0x31] sm:$0xff] }
 0x121   : > { %v810_v54 = vpop.permute.xlu1 %809  ;;  %v816_v49 = vpop.permute.xlu0 %815 }
 0x122   : > { %905 = vst.msk [vmem:[#allocation3 + $0x8] sm:$0xff] %vm903_vm4, %v810_v54  ;;  %908 = vst.msk [vmem:[#allocation3 + $0x20] sm:$0xff] %vm903_vm4, %v816_v49 }
 0x123   : > { %1391 = vrot.lane.b32.xlu1 %v2636_v52, %s2410_s24  ;;  %1425 = vrot.lane.b32.xlu0 %v2717_v10, %s2410_s24 }
 0x125   : > { %v814_v8 = vpop.permute.xlu1 %813  ;;  %v820_v5 = vpop.permute.xlu0 %819 }
 0x126   : > { %907 = vst.msk [vmem:[#allocation3 + $0x18] sm:$0xff] %vm903_vm4, %v814_v8  ;;  %910 = vst.msk [vmem:[#allocation3 + $0x30] sm:$0xff] %vm903_vm4, %v820_v5 }
 0x127   : > { %1423 = vrot.lane.b32.xlu1 %v2703_v7, %s2410_s24  ;;  %1582 = vrot.lane.b32.xlu0 %v2579_v31, %s2411_s25  ;;  %v1519_v7 = vld [vmem:[#allocation2 + $0x51] sm:$0xff]  ;;  %v1518_v31 = vld [vmem:[#allocation2 + $0x49] sm:$0xff] }
 0x129   : > { %v818_v19 = vpop.permute.xlu1 %817  ;;  %v824_v52 = vpop.permute.xlu0 %823 }
 0x12a   : > { %909 = vst.msk [vmem:[#allocation3 + $0x28] sm:$0xff] %vm903_vm4, %v818_v19  ;;  %912 = vst.msk [vmem:[#allocation3 + $0x40] sm:$0xff] %vm903_vm4, %v824_v52  ;;  %v1522_v52 = vld [vmem:[#allocation2 + $0x79] sm:$0xff] }
 0x12b   : > { %1580 = vrot.lane.b32.xlu1 %v1516_v57, %s2411_s25  ;;  %1614 = vrot.lane.b32.xlu0 %v2744_v17, %s2411_s25 }
 0x12d   : > { %v822_v10 = vpop.permute.xlu1 %821  ;;  %v828_v29 = vpop.permute.xlu0 %827 }
 0x12e   : > { %911 = vst.msk [vmem:[#allocation3 + $0x38] sm:$0xff] %vm903_vm4, %v822_v10  ;;  %914 = vst.msk [vmem:[#allocation3 + $0x50] sm:$0xff] %vm903_vm4, %v828_v29 }
 0x12f   : > { %1612 = vrot.lane.b32.xlu1 %v2719_v11, %s2411_s25  ;;  %1586 = vrot.lane.b32.xlu0 %v1519_v7, %s2411_s25  ;;  %v2028_v11 = vsel %vm2026_vm5, %v2393_v24, 0  ;;  %v1539_v7 = vld [vmem:[#allocation2 + $0x141] sm:$0xff]  ;;  %v1714_v24 = vld [vmem:[#allocation2 + $0x6a] sm:$0xff] }
 0x130   : > { %2331 = vmatpush3.bf16.msra.mxu0 %v2028_v11  ;;  %2371 = vmatpush3.bf16.msra.mxu1 %v2028_v11  ;;  %v1713_v11 = vld [vmem:[#allocation2 + $0x62] sm:$0xff] }
 0x131   : > { %v826_v36 = vpop.permute.xlu1 %825  ;;  %v832_v17 = vpop.permute.xlu0 %831  ;;  %2332 = vmatprep.subr.bf16.mxu0 %v2394_v39  ;;  %2369 = vmatprep.subr.bf16.mxu1 %v2394_v39 }
 0x132   : > { %913 = vst.msk [vmem:[#allocation3 + $0x48] sm:$0xff] %vm903_vm4, %v826_v36  ;;  %916 = vst.msk [vmem:[#allocation3 + $0x60] sm:$0xff] %vm903_vm4, %v832_v17 }
 0x133   : > { %1584 = vrot.lane.b32.xlu1 %v1518_v31, %s2411_s25  ;;  %1618 = vrot.lane.b32.xlu0 %v2758_v21, %s2411_s25  ;;  %v1538_v31 = vld [vmem:[#allocation2 + $0x139] sm:$0xff] }
 0x134   : > { %2333 = vmatpush3.bf16.msra.mxu0 %v2394_v39  ;;  %2372 = vmatpush3.bf16.msra.mxu1 %v2394_v39  ;;  %v1730_v39 = vld [vmem:[#allocation2 + $0x12a] sm:$0xff] }
 0x135   : > { %v830_v53 = vpop.permute.xlu1 %829  ;;  %v836_v60 = vpop.permute.xlu0 %835  ;;  %2334 = vmatprep.subr.bf16.mxu0 %v2395_v62  ;;  %2370 = vmatprep.subr.bf16.mxu1 %v2395_v62 }
 0x136   : > { %915 = vst.msk [vmem:[#allocation3 + $0x58] sm:$0xff] %vm903_vm4, %v830_v53  ;;  %918 = vst.msk [vmem:[#allocation3 + $0x70] sm:$0xff] %vm903_vm4, %v836_v60 }
 0x137   : > { %1616 = vrot.lane.b32.xlu1 %v2738_v15, %s2411_s25  ;;  %1775 = vrot.lane.b32.xlu0 %v2803_v63, %s2412_s30 }
 0x138   : > { %2335 = vmatpush3.bf16.msra.mxu0 %v2395_v62  ;;  %2373 = vmatpush3.bf16.msra.mxu1 %v2395_v62 }
 0x139   : > { %v834_v23 = vpop.permute.xlu1 %833  ;;  %v840_v15 = vpop.permute.xlu0 %839 }
 0x13a   : > { %917 = vst.msk [vmem:[#allocation3 + $0x68] sm:$0xff] %vm903_vm4, %v834_v23  ;;  %920 = vst.msk [vmem:[#allocation3 + $0x80] sm:$0xff] %vm903_vm4, %v840_v15  ;;  %v1729_v23 = vld [vmem:[#allocation2 + $0x122] sm:$0xff] }
 0x13b   : > { %1773 = vrot.lane.b32.xlu1 %v2792_v47, %s2412_s30  ;;  %1807 = vrot.lane.b32.xlu0 %v2843_v37, %s2412_s30  ;;  %v1716_v15 = vld [vmem:[#allocation2 + $0x82] sm:$0xff] }
 0x13d   : > { %v838_v0 = vpop.permute.xlu1 %837  ;;  %v844_v63 = vpop.permute.xlu0 %843 }
 0x13e   : > { %919 = vst.msk [vmem:[#allocation3 + $0x78] sm:$0xff] %vm903_vm4, %v838_v0  ;;  %922 = vst.msk [vmem:[#allocation3 + $0x90] sm:$0xff] %vm903_vm4, %v844_v63  ;;  %v1715_v63 = vld [vmem:[#allocation2 + $0x7a] sm:$0xff] }
 0x13f   : > { %1805 = vrot.lane.b32.xlu1 %v2832_v34, %s2412_s30  ;;  %1779 = vrot.lane.b32.xlu0 %v3606_v1, %s2412_s30  ;;  %v3609_v34 = vld [vmem:[#allocation9_spill] sm:$0xff] }
 0x141   : > { %v842_v47 = vpop.permute.xlu1 %841  ;;  %v848_v37 = vpop.permute.xlu0 %847 }
 0x142   : > { %921 = vst.msk [vmem:[#allocation3 + $0x88] sm:$0xff] %vm903_vm4, %v842_v47  ;;  %924 = vst.msk [vmem:[#allocation3 + $0xa0] sm:$0xff] %vm903_vm4, %v848_v37  ;;  %v1731_v37 = vld [vmem:[#allocation2 + $0x13a] sm:$0xff] }
 0x143   : > { %1777 = vrot.lane.b32.xlu1 %v3607_v25, %s2412_s30  ;;  %1811 = vrot.lane.b32.xlu0 %v3608_v26, %s2412_s30 }
 0x145   : > { %v846_v2 = vpop.permute.xlu1 %845  ;;  %v852_v27 = vpop.permute.xlu0 %851 }
 0x146   : > { %923 = vst.msk [vmem:[#allocation3 + $0x98] sm:$0xff] %vm903_vm4, %v846_v2  ;;  %926 = vst.msk [vmem:[#allocation3 + $0xb0] sm:$0xff] %vm903_vm4, %v852_v27  ;;  %v3211_v27 = vld [vmem:[#allocation2 + $0x151] sm:$0xff] }
 0x147   : > { %1809 = vrot.lane.b32.xlu1 %v3609_v34, %s2412_s30  ;;  %1042 = vrot.lane.b32.xlu0 %v2758_v21, %s2408_s22 }
 0x149   : > { %v850_v3 = vpop.permute.xlu1 %849  ;;  %v856_v32 = vpop.permute.xlu0 %855 }
 0x14a   : > { %925 = vst.msk [vmem:[#allocation3 + $0xa8] sm:$0xff] %vm903_vm4, %v850_v3  ;;  %928 = vst.msk [vmem:[#allocation3 + $0xc0] sm:$0xff] %vm903_vm4, %v856_v32  ;;  %v3215_v3 = vld [vmem:[#allocation2 + $0x99] sm:$0xff] }
 0x14b   : > { %1040 = vrot.lane.b32.xlu1 %v956_v30, %s2408_s22  ;;  %1046 = vrot.lane.b32.xlu0 %v3610_v41, %s2408_s22 }
 0x14d   : > { %v854_v40 = vpop.permute.xlu1 %853  ;;  %v860_v42 = vpop.permute.xlu0 %859 }
 0x14e   : > { %927 = vst.msk [vmem:[#allocation3 + $0xb8] sm:$0xff] %vm903_vm4, %v854_v40  ;;  %930 = vst.msk [vmem:[#allocation3 + $0xd0] sm:$0xff] %vm903_vm4, %v860_v42  ;;  %v3223_v40 = vld [vmem:[#allocation2 + $0x159] sm:$0xff] }
 0x14f   : > { %1044 = vrot.lane.b32.xlu1 %v3120_v38, %s2408_s22  ;;  %1203 = vrot.lane.b32.xlu0 %v3606_v1, %s2409_s23  ;;  %v1732_v1 = vld [vmem:[#allocation2 + $0x142] sm:$0xff] }
 0x151   : > { %v858_v21 = vpop.permute.xlu1 %857  ;;  %v864_v43 = vpop.permute.xlu0 %863 }
 0x152   : > { %929 = vst.msk [vmem:[#allocation3 + $0xc8] sm:$0xff] %vm903_vm4, %v858_v21  ;;  %932 = vst.msk [vmem:[#allocation3 + $0xe0] sm:$0xff] %vm903_vm4, %v864_v43  ;;  %v3232_v43 = vld [vmem:[#allocation2 + $0x92] sm:$0xff] }
 0x153   : > { %1201 = vrot.lane.b32.xlu1 %v3607_v25, %s2409_s23  ;;  %1235 = vrot.lane.b32.xlu0 %v3608_v26, %s2409_s23 }
 0x155   : > { %v862_v13 = vpop.permute.xlu1 %861  ;;  %v868_v56 = vpop.permute.xlu0 %867 }
 0x156   : > { %931 = vst.msk [vmem:[#allocation3 + $0xd8] sm:$0xff] %vm903_vm4, %v862_v13  ;;  %934 = vst.msk [vmem:[#allocation3 + $0xf0] sm:$0xff] %vm903_vm4, %v868_v56 }
 0x157   : > { %1233 = vrot.lane.b32.xlu1 %v3609_v34, %s2409_s23  ;;  %1207 = vrot.lane.b32.xlu0 %v3611_v48, %s2409_s23 }
 0x159   : > { %v866_v4 = vpop.permute.xlu1 %865  ;;  %v1001_v45 = vpop.permute.xlu0 %1000 }
 0x15a   : > { %933 = vst.msk [vmem:[#allocation3 + $0xe8] sm:$0xff] %vm903_vm4, %v866_v4  ;;  %v3239_v4 = vld [vmem:[#allocation2 + $0x152] sm:$0xff] }
 0x15b   : > { %1205 = vrot.lane.b32.xlu1 %v3612_v51, %s2409_s23  ;;  %1097 = vst.msk [vmem:[#allocation3] sm:$0xff] %vm1096_vm6, %v1001_v45  ;;  %1239 = vrot.lane.b32.xlu0 %v3613_v46, %s2409_s23  ;;  %v3243_v51 = vld [vmem:[#allocation2 + $0x9a] sm:$0xff] }
 0x15d   : > { %v870_v35 = vpop.permute.xlu1 %869  ;;  %v1005_v33 = vpop.permute.xlu0 %1004 }
 0x15e   : > { %935 = vst.msk [vmem:[#allocation3 + $0xf8] sm:$0xff] %vm903_vm4, %v870_v35  ;;  %v1331_v35 = vld [vmem:[#allocation2 + $0x90] sm:$0xff] }
 0x15f   : > { %1237 = vrot.lane.b32.xlu1 %v3614_v6, %s2409_s23  ;;  %1099 = vst.msk [vmem:[#allocation3 + $0x10] sm:$0xff] %vm1096_vm6, %v1005_v33  ;;  %1397 = vrot.lane.b32.xlu0 %v2655_v59, %s2410_s24  ;;  %v3251_v6 = vld [vmem:[#allocation2 + $0x15a] sm:$0xff] }
 0x161   : > { %v1003_v44 = vpop.permute.xlu1 %1002  ;;  %v1009_v50 = vpop.permute.xlu0 %1008 }
 0x162   : > { %1098 = vst.msk [vmem:[#allocation3 + $0x8] sm:$0xff] %vm1096_vm6, %v1003_v44  ;;  %1101 = vst.msk [vmem:[#allocation3 + $0x20] sm:$0xff] %vm1096_vm6, %v1009_v50  ;;  %v1332_v50 = vld [vmem:[#allocation2 + $0x98] sm:$0xff] }
 0x163   : > { %1395 = vrot.lane.b32.xlu1 %v2643_v55, %s2410_s24  ;;  %1429 = vrot.lane.b32.xlu0 %v2732_v14, %s2410_s24 }
 0x165   : > { %v1007_v54 = vpop.permute.xlu1 %1006  ;;  %v1013_v49 = vpop.permute.xlu0 %1012 }
 0x166   : > { %1100 = vst.msk [vmem:[#allocation3 + $0x18] sm:$0xff] %vm1096_vm6, %v1007_v54  ;;  %1103 = vst.msk [vmem:[#allocation3 + $0x30] sm:$0xff] %vm1096_vm6, %v1013_v49  ;;  %v1333_v49 = vld [vmem:[#allocation2 + $0xa8] sm:$0xff] }
 0x167   : > { %1427 = vrot.lane.b32.xlu1 %v2715_v9, %s2410_s24  ;;  %1401 = vrot.lane.b32.xlu0 %v2666_v61, %s2410_s24  ;;  %v1521_v9 = vld [vmem:[#allocation2 + $0x69] sm:$0xff]  ;;  %v1520_v61 = vld [vmem:[#allocation2 + $0x61] sm:$0xff] }
 0x169   : > { %v1011_v59 = vpop.permute.xlu1 %1010  ;;  %v1017_v55 = vpop.permute.xlu0 %1016 }
 0x16a   : > { %1102 = vst.msk [vmem:[#allocation3 + $0x28] sm:$0xff] %vm1096_vm6, %v1011_v59  ;;  %1105 = vst.msk [vmem:[#allocation3 + $0x40] sm:$0xff] %vm1096_vm6, %v1017_v55 }
 0x16b   : > { %1399 = vrot.lane.b32.xlu1 %v2653_v58, %s2410_s24  ;;  %1433 = vrot.lane.b32.xlu0 %v2748_v18, %s2410_s24  ;;  %v1537_v58 = vld [vmem:[#allocation2 + $0x129] sm:$0xff] }
 0x16d   : > { %v1015_v14 = vpop.permute.xlu1 %1014  ;;  %v1021_v8 = vpop.permute.xlu0 %1020 }
 0x16e   : > { %1104 = vst.msk [vmem:[#allocation3 + $0x38] sm:$0xff] %vm1096_vm6, %v1015_v14  ;;  %1107 = vst.msk [vmem:[#allocation3 + $0x50] sm:$0xff] %vm1096_vm6, %v1021_v8 }
 0x16f   : > { %1431 = vrot.lane.b32.xlu1 %v2726_v12, %s2410_s24  ;;  %1590 = vrot.lane.b32.xlu0 %v1521_v9, %s2411_s25  ;;  %v1523_v12 = vld [vmem:[#allocation2 + $0x81] sm:$0xff] }
 0x171   : > { %v1019_v5 = vpop.permute.xlu1 %1018  ;;  %v1035_v57 = vpop.permute.xlu0 %1034 }
 0x172   : > { %1106 = vst.msk [vmem:[#allocation3 + $0x48] sm:$0xff] %vm1096_vm6, %v1019_v5  ;;  %1114 = vst.msk [vmem:[#allocation3 + $0x88] sm:$0xff] %vm1096_vm6, %v1035_v57 }
 0x173   : > { %1588 = vrot.lane.b32.xlu1 %v1520_v61, %s2411_s25  ;;  %1622 = vrot.lane.b32.xlu0 %v1537_v58, %s2411_s25  ;;  %v1524_v58 = vld [vmem:[#allocation2 + $0x91] sm:$0xff] }
 0x175   : > { %v1033_v18 = vpop.permute.xlu1 %1032  ;;  %v1039_v19 = vpop.permute.xlu0 %1038 }
 0x176   : > { %1113 = vst.msk [vmem:[#allocation3 + $0x80] sm:$0xff] %vm1096_vm6, %v1033_v18  ;;  %1116 = vst.msk [vmem:[#allocation3 + $0x98] sm:$0xff] %vm1096_vm6, %v1039_v19 }
 0x177   : > { %1620 = vrot.lane.b32.xlu1 %v3120_v38, %s2411_s25  ;;  %1594 = vrot.lane.b32.xlu0 %v1523_v12, %s2411_s25 }
 0x179   : > { %v1037_v10 = vpop.permute.xlu1 %1036  ;;  %v1196_v29 = vpop.permute.xlu0 %1195 }
 0x17a   : > { %1115 = vst.msk [vmem:[#allocation3 + $0x90] sm:$0xff] %vm1096_vm6, %v1037_v10 }
 0x17b   : > { %1592 = vrot.lane.b32.xlu1 %v1522_v52, %s2411_s25  ;;  %1291 = vst.msk [vmem:[#allocation3 + $0x8] sm:$0xff] %vm1289_vm7, %v1196_v29  ;;  %1626 = vrot.lane.b32.xlu0 %v1539_v7, %s2411_s25 }
 0x17d   : > { %v1194_v36 = vpop.permute.xlu1 %1193  ;;  %v1228_v17 = vpop.permute.xlu0 %1227 }
 0x17e   : > { %1290 = vst.msk [vmem:[#allocation3] sm:$0xff] %vm1289_vm7, %v1194_v36  ;;  %1307 = vst.msk [vmem:[#allocation3 + $0x88] sm:$0xff] %vm1289_vm7, %v1228_v17 }
 0x17f   : > { %1624 = vrot.lane.b32.xlu1 %v1538_v31, %s2411_s25  ;;  %1783 = vrot.lane.b32.xlu0 %v1714_v24, %s2412_s30 }
 0x181   : > { %v1226_v53 = vpop.permute.xlu1 %1225  ;;  %v1200_v60 = vpop.permute.xlu0 %1199 }
 0x182   : > { %1306 = vst.msk [vmem:[#allocation3 + $0x80] sm:$0xff] %vm1289_vm7, %v1226_v53  ;;  %1293 = vst.msk [vmem:[#allocation3 + $0x18] sm:$0xff] %vm1289_vm7, %v1200_v60  ;;  %v1542_v53 = vld [vmem:[#allocation2 + $0x169] sm:$0xff]  ;;  %v1527_v60 = vld [vmem:[#allocation2 + $0xb1] sm:$0xff] }
 0x183   : > { %1781 = vrot.lane.b32.xlu1 %v1713_v11, %s2412_s30  ;;  %1815 = vrot.lane.b32.xlu0 %v1730_v39, %s2412_s30 }
 0x185   : > { %v1198_v62 = vpop.permute.xlu1 %1197  ;;  %v1232_v0 = vpop.permute.xlu0 %1231 }
 0x186   : > { %1292 = vst.msk [vmem:[#allocation3 + $0x10] sm:$0xff] %vm1289_vm7, %v1198_v62  ;;  %1309 = vst.msk [vmem:[#allocation3 + $0x98] sm:$0xff] %vm1289_vm7, %v1232_v0 }
 0x187   : > { %1813 = vrot.lane.b32.xlu1 %v1729_v23, %s2412_s30  ;;  %1787 = vrot.lane.b32.xlu0 %v1716_v15, %s2412_s30 }
 0x189   : > { %v1230_v47 = vpop.permute.xlu1 %1229  ;;  %v1390_v25 = vpop.permute.xlu0 %1389 }
 0x18a   : > { %1308 = vst.msk [vmem:[#allocation3 + $0x90] sm:$0xff] %vm1289_vm7, %v1230_v47 }
 0x18b   : > { %1785 = vrot.lane.b32.xlu1 %v1715_v63, %s2412_s30  ;;  %1485 = vst.msk [vmem:[#allocation3 + $0x8] sm:$0xff] %vm1483_vm8, %v1390_v25  ;;  %1819 = vrot.lane.b32.xlu0 %v1732_v1, %s2412_s30 }
 0x18d   : > { %v1388_v2 = vpop.permute.xlu1 %1387  ;;  %v1422_v26 = vpop.permute.xlu0 %1421 }
 0x18e   : > { %1484 = vst.msk [vmem:[#allocation3] sm:$0xff] %vm1483_vm8, %v1388_v2  ;;  %1501 = vst.msk [vmem:[#allocation3 + $0x88] sm:$0xff] %vm1483_vm8, %v1422_v26  ;;  %v1735_v2 = vld [vmem:[#allocation2 + $0x16a] sm:$0xff] }
 0x18f   : > { %1817 = vrot.lane.b32.xlu1 %v1731_v37, %s2412_s30  ;;  %1050 = vrot.lane.b32.xlu0 %v1539_v7, %s2408_s22 }
 0x191   : > { %v1420_v34 = vpop.permute.xlu1 %1419  ;;  %v1394_v30 = vpop.permute.xlu0 %1393 }
 0x192   : > { %1500 = vst.msk [vmem:[#allocation3 + $0x80] sm:$0xff] %vm1483_vm8, %v1420_v34  ;;  %1487 = vst.msk [vmem:[#allocation3 + $0x18] sm:$0xff] %vm1483_vm8, %v1394_v30  ;;  %v1720_v34 = vld [vmem:[#allocation2 + $0xb2] sm:$0xff] }
 0x193   : > { %1048 = vrot.lane.b32.xlu1 %v1538_v31, %s2408_s22  ;;  %1052 = vrot.lane.b32.xlu0 %v3211_v27, %s2408_s22  ;;  %v1526_v31 = vld [vmem:[#allocation2 + $0xa9] sm:$0xff] }
 0x195   : > { %v1392_v32 = vpop.permute.xlu1 %1391  ;;  %v1426_v38 = vpop.permute.xlu0 %1425 }
 0x196   : > { %1486 = vst.msk [vmem:[#allocation3 + $0x10] sm:$0xff] %vm1483_vm8, %v1392_v32  ;;  %1503 = vst.msk [vmem:[#allocation3 + $0x98] sm:$0xff] %vm1483_vm8, %v1426_v38 }
 0x197   : > { %1022 = vrot.lane.b32.xlu1 %v3215_v3, %s2408_s22  ;;  %1209 = vrot.lane.b32.xlu0 %v1715_v63, %s2409_s23 }
 0x199   : > { %v1424_v41 = vpop.permute.xlu1 %1423  ;;  %v1583_v42 = vpop.permute.xlu0 %1582 }
 0x19a   : > { %1502 = vst.msk [vmem:[#allocation3 + $0x90] sm:$0xff] %vm1483_vm8, %v1424_v41  ;;  %v3323_v41 = vld [vmem:[#allocation2 + $0xc1] sm:$0xff] }
 0x19b   : > { %1054 = vrot.lane.b32.xlu1 %v3223_v40, %s2408_s22  ;;  %1678 = vst.msk [vmem:[#allocation3 + $0x8] sm:$0xff] %vm1676_vm9, %v1583_v42  ;;  %1241 = vrot.lane.b32.xlu0 %v1731_v37, %s2409_s23 }
 0x19d   : > { %v1581_v21 = vpop.permute.xlu1 %1580  ;;  %v1615_v13 = vpop.permute.xlu0 %1614 }
 0x19e   : > { %1677 = vst.msk [vmem:[#allocation3] sm:$0xff] %vm1676_vm9, %v1581_v21  ;;  %1694 = vst.msk [vmem:[#allocation3 + $0x88] sm:$0xff] %vm1676_vm9, %v1615_v13 }
 0x19f   : > { %1211 = vrot.lane.b32.xlu1 %v1716_v15, %s2409_s23  ;;  %1213 = vrot.lane.b32.xlu0 %v3232_v43, %s2409_s23  ;;  %v1543_v15 = vld [vmem:[#allocation2 + $0x171] sm:$0xff] }
 0x1a1   : > { %v1613_v56 = vpop.permute.xlu1 %1612  ;;  %v1587_v48 = vpop.permute.xlu0 %1586 }
 0x1a2   : > { %1693 = vst.msk [vmem:[#allocation3 + $0x80] sm:$0xff] %vm1676_vm9, %v1613_v56  ;;  %1680 = vst.msk [vmem:[#allocation3 + $0x18] sm:$0xff] %vm1676_vm9, %v1587_v48  ;;  %v3334_v56 = vld [vmem:[#allocation2 + $0xc9] sm:$0xff] }
 0x1a3   : > { %1243 = vrot.lane.b32.xlu1 %v1732_v1, %s2409_s23  ;;  %1245 = vrot.lane.b32.xlu0 %v3239_v4, %s2409_s23  ;;  %v1719_v1 = vld [vmem:[#allocation2 + $0xaa] sm:$0xff] }
 0x1a5   : > { %v1585_v45 = vpop.permute.xlu1 %1584  ;;  %v1619_v46 = vpop.permute.xlu0 %1618 }
 0x1a6   : > { %1679 = vst.msk [vmem:[#allocation3 + $0x10] sm:$0xff] %vm1676_vm9, %v1585_v45  ;;  %1696 = vst.msk [vmem:[#allocation3 + $0x98] sm:$0xff] %vm1676_vm9, %v1619_v46 }
 0x1a7   : > { %1215 = vrot.lane.b32.xlu1 %v3243_v51, %s2409_s23  ;;  %1403 = vrot.lane.b32.xlu0 %v1331_v35, %s2410_s24 }
 0x1a9   : > { %v1617_v33 = vpop.permute.xlu1 %1616  ;;  %v1776_v44 = vpop.permute.xlu0 %1775 }
 0x1aa   : > { %1695 = vst.msk [vmem:[#allocation3 + $0x90] sm:$0xff] %vm1676_vm9, %v1617_v33 }
 0x1ab   : > { %1247 = vrot.lane.b32.xlu1 %v3251_v6, %s2409_s23  ;;  %1871 = vst.msk [vmem:[#allocation3 + $0x8] sm:$0xff] %vm1869_vm10, %v1776_v44  ;;  %1435 = vrot.lane.b32.xlu0 %v2742_v16, %s2410_s24  ;;  %v1334_v16 = vld [vmem:[#allocation2 + $0xb0] sm:$0xff] }
 0x1ad   : > { %v1774_v54 = vpop.permute.xlu1 %1773  ;;  %v1808_v59 = vpop.permute.xlu0 %1807 }
 0x1ae   : > { %1870 = vst.msk [vmem:[#allocation3] sm:$0xff] %vm1869_vm10, %v1774_v54  ;;  %1887 = vst.msk [vmem:[#allocation3 + $0x88] sm:$0xff] %vm1869_vm10, %v1808_v59 }
 0x1af   : > { %1405 = vrot.lane.b32.xlu1 %v1332_v50, %s2410_s24  ;;  %1407 = vrot.lane.b32.xlu0 %v1333_v49, %s2410_s24  ;;  %v3358_v50 = vld [vmem:[#allocation2 + $0x182] sm:$0xff]  ;;  %v3362_v49 = vld [vmem:[#allocation2 + $0xca] sm:$0xff] }
 0x1b1   : > { %v1806_v55 = vpop.permute.xlu1 %1805  ;;  %v1780_v14 = vpop.permute.xlu0 %1779 }
 0x1b2   : > { %1886 = vst.msk [vmem:[#allocation3 + $0x80] sm:$0xff] %vm1869_vm10, %v1806_v55  ;;  %v1903_v9 = vld [vmem:[#allocation3 + $0x8] sm:$0xff]  ;;  %1873 = vst.msk [vmem:[#allocation3 + $0x18] sm:$0xff] %vm1869_vm10, %v1780_v14  ;;  %v1335_v55 = vld [vmem:[#allocation2 + $0xc0] sm:$0xff] }
 0x1b3   : > { %1437 = vrot.lane.b32.xlu1 %v2762_v22, %s2410_s24  ;;  %1439 = vrot.lane.b32.xlu0 %v2756_v20, %s2410_s24 }
 0x1b5   : > { %v1778_v8 = vpop.permute.xlu1 %1777  ;;  %v1902_v61 = vld [vmem:[#allocation3] sm:$0xff]  ;;  %v1812_v57 = vpop.permute.xlu0 %1811  ;;  %v1919_v18 = vld [vmem:[#allocation3 + $0x88] sm:$0xff] }
 0x1b6   : > { %1872 = vst.msk [vmem:[#allocation3 + $0x10] sm:$0xff] %vm1869_vm10, %v1778_v8  ;;  %v1934_v5 = vpack.c.bf16 %v1903_v9, %v1902_v61  ;;  %1889 = vst.msk [vmem:[#allocation3 + $0x98] sm:$0xff] %vm1869_vm10, %v1812_v57  ;;  %v3370_v9 = vld [vmem:[#allocation2 + $0x18a] sm:$0xff]  ;;  %v1351_v8 = vld [vmem:[#allocation2 + $0x180] sm:$0xff] }
 0x1b7   : > { %1409 = vrot.lane.b32.xlu1 %v1334_v16, %s2410_s24  ;;  %1596 = vrot.lane.b32.xlu0 %v1524_v58, %s2411_s25  ;;  %v1336_v58 = vld [vmem:[#allocation2 + $0xc8] sm:$0xff] }
 0x1b8   : > { %2336 = vmatprep.mubr.msk.bf16.mxu0 %vm1977_vm11, %v1934_v5 }
 0x1b9   : > { %v1810_v22 = vpop.permute.xlu1 %1809  ;;  %v1918_v12 = vld [vmem:[#allocation3 + $0x80] sm:$0xff]  ;;  %v1043_v20 = vpop.permute.xlu0 %1042  ;;  %v1905_v52 = vld [vmem:[#allocation3 + $0x18] sm:$0xff] }
 0x1ba   : > { %1888 = vst.msk [vmem:[#allocation3 + $0x90] sm:$0xff] %vm1869_vm10, %v1810_v22  ;;  %v1942_v19 = vpack.c.bf16 %v1919_v18, %v1918_v12  ;;  %v1337_v12 = vld [vmem:[#allocation2 + $0xd8] sm:$0xff] }
 0x1bb   : > { %1441 = vrot.lane.b32.xlu1 %v2771_v28, %s2410_s24  ;;  %1118 = vst.msk [vmem:[#allocation3 + $0xa8] sm:$0xff] %vm1096_vm6, %v1043_v20  ;;  %1628 = vrot.lane.b32.xlu0 %v3211_v27, %s2411_s25 }
 0x1bc   : > { %2352 = vmatprep.mubr.msk.bf16.mxu1 %vm1977_vm11, %v1942_v19 }
 0x1bd   : > { %v1041_v10 = vpop.permute.xlu1 %1040  ;;  %v1904_v7 = vld [vmem:[#allocation3 + $0x10] sm:$0xff]  ;;  %v1047_v36 = vpop.permute.xlu0 %1046  ;;  %v1921_v28 = vld [vmem:[#allocation3 + $0x98] sm:$0xff] }
 0x1be   : > { %1117 = vst.msk [vmem:[#allocation3 + $0xa0] sm:$0xff] %vm1096_vm6, %v1041_v10  ;;  %v1935_v29 = vpack.c.bf16 %v1905_v52, %v1904_v7  ;;  %1120 = vst.msk [vmem:[#allocation3 + $0xb8] sm:$0xff] %vm1096_vm6, %v1047_v36  ;;  %v1352_v52 = vld [vmem:[#allocation2 + $0x188] sm:$0xff] }
 0x1bf   : > { %1598 = vrot.lane.b32.xlu1 %v3215_v3, %s2411_s25  ;;  %1600 = vrot.lane.b32.xlu0 %v1526_v31, %s2411_s25  ;;  %v1736_v3 = vld [vmem:[#allocation2 + $0x172] sm:$0xff] }
 0x1c0   : > { %2337 = vmatmul.mubr.msk.bf16.vlgmr.msra.gmra.mxu0 %vm1977_vm11, %v1935_v29 }
 0x1c1   : > { %v1045_v24 = vpop.permute.xlu1 %1044  ;;  %v1920_v17 = vld [vmem:[#allocation3 + $0x90] sm:$0xff]  ;;  %v1204_v39 = vpop.permute.xlu0 %1203 }
 0x1c2   : > { %1119 = vst.msk [vmem:[#allocation3 + $0xb0] sm:$0xff] %vm1096_vm6, %v1045_v24  ;;  %v1943_v11 = vpack.c.bf16 %v1921_v28, %v1920_v17  ;;  %v1338_v24 = vld [vmem:[#allocation2 + $0xe0] sm:$0xff] }
 0x1c3   : > { %1630 = vrot.lane.b32.xlu1 %v3223_v40, %s2411_s25  ;;  %1295 = vst.msk [vmem:[#allocation3 + $0x28] sm:$0xff] %vm1289_vm7, %v1204_v39  ;;  %1632 = vrot.lane.b32.xlu0 %v1542_v53, %s2411_s25 }
 0x1c4   : > { %2353 = vmatmul.mubr.msk.bf16.vlgmr.msra.gmra.mxu1 %vm1977_vm11, %v1943_v11 }
 0x1c5   : > { %v1202_v23 = vpop.permute.xlu1 %1201  ;;  %v1236_v62 = vpop.permute.xlu0 %1235 }
 0x1c6   : > { %1294 = vst.msk [vmem:[#allocation3 + $0x20] sm:$0xff] %vm1289_vm7, %v1202_v23  ;;  %1311 = vst.msk [vmem:[#allocation3 + $0xa8] sm:$0xff] %vm1289_vm7, %v1236_v62  ;;  %v1354_v23 = vld [vmem:[#allocation2 + $0x1a0] sm:$0xff] }
 0x1c7   : > { %1602 = vrot.lane.b32.xlu1 %v1527_v60, %s2411_s25  ;;  %1789 = vrot.lane.b32.xlu0 %v3232_v43, %s2412_s30  ;;  %v3330_v43 = vld [vmem:[#allocation2 + $0x181] sm:$0xff] }
 0x1c9   : > { %v1234_v0 = vpop.permute.xlu1 %1233  ;;  %v1208_v63 = vpop.permute.xlu0 %1207 }
 0x1ca   : > { %1310 = vst.msk [vmem:[#allocation3 + $0xa0] sm:$0xff] %vm1289_vm7, %v1234_v0  ;;  %1297 = vst.msk [vmem:[#allocation3 + $0x38] sm:$0xff] %vm1289_vm7, %v1208_v63 }
 0x1cb   : > { %1634 = vrot.lane.b32.xlu1 %v1543_v15, %s2411_s25  ;;  %1821 = vrot.lane.b32.xlu0 %v3239_v4, %s2412_s30 }
 0x1cd   : > { %v1206_v47 = vpop.permute.xlu1 %1205  ;;  %v1240_v25 = vpop.permute.xlu0 %1239 }
 0x1ce   : > { %1296 = vst.msk [vmem:[#allocation3 + $0x30] sm:$0xff] %vm1289_vm7, %v1206_v47  ;;  %1313 = vst.msk [vmem:[#allocation3 + $0xb8] sm:$0xff] %vm1289_vm7, %v1240_v25 }
 0x1cf   : > { %1791 = vrot.lane.b32.xlu1 %v3243_v51, %s2412_s30  ;;  %1793 = vrot.lane.b32.xlu0 %v1719_v1, %s2412_s30  ;;  %v3342_v51 = vld [vmem:[#allocation2 + $0x189] sm:$0xff] }
 0x1d1   : > { %v1238_v37 = vpop.permute.xlu1 %1237  ;;  %v1398_v26 = vpop.permute.xlu0 %1397 }
 0x1d2   : > { %1312 = vst.msk [vmem:[#allocation3 + $0xb0] sm:$0xff] %vm1289_vm7, %v1238_v37 }
 0x1d3   : > { %1823 = vrot.lane.b32.xlu1 %v3251_v6, %s2412_s30  ;;  %1489 = vst.msk [vmem:[#allocation3 + $0x28] sm:$0xff] %vm1483_vm8, %v1398_v26  ;;  %1825 = vrot.lane.b32.xlu0 %v1735_v2, %s2412_s30  ;;  %v3351_v6 = vld [vmem:[#allocation2 + $0xc2] sm:$0xff] }
 0x1d5   : > { %v1396_v27 = vpop.permute.xlu1 %1395  ;;  %v1430_v30 = vpop.permute.xlu0 %1429 }
 0x1d6   : > { %1488 = vst.msk [vmem:[#allocation3 + $0x20] sm:$0xff] %vm1483_vm8, %v1396_v27  ;;  %1505 = vst.msk [vmem:[#allocation3 + $0xa8] sm:$0xff] %vm1483_vm8, %v1430_v30 }
 0x1d7   : > { %1795 = vrot.lane.b32.xlu1 %v1720_v34, %s2412_s30  ;;  %1024 = vrot.lane.b32.xlu0 %v1526_v31, %s2408_s22  ;;  %v1353_v31 = vld [vmem:[#allocation2 + $0x198] sm:$0xff] }
 0x1d9   : > { %v1428_v32 = vpop.permute.xlu1 %1427  ;;  %v1402_v38 = vpop.permute.xlu0 %1401 }
 0x1da   : > { %1504 = vst.msk [vmem:[#allocation3 + $0xa0] sm:$0xff] %vm1483_vm8, %v1428_v32  ;;  %1491 = vst.msk [vmem:[#allocation3 + $0x38] sm:$0xff] %vm1483_vm8, %v1402_v38 }
 0x1db   : > { %1827 = vrot.lane.b32.xlu1 %v1736_v3, %s2412_s30  ;;  %1056 = vrot.lane.b32.xlu0 %v1542_v53, %s2408_s22 }
 0x1dd   : > { %v1400_v40 = vpop.permute.xlu1 %1399  ;;  %v1434_v42 = vpop.permute.xlu0 %1433 }
 0x1de   : > { %1490 = vst.msk [vmem:[#allocation3 + $0x30] sm:$0xff] %vm1483_vm8, %v1400_v40  ;;  %1507 = vst.msk [vmem:[#allocation3 + $0xb8] sm:$0xff] %vm1483_vm8, %v1434_v42 }
 0x1df   : > { %1026 = vrot.lane.b32.xlu1 %v1527_v60, %s2408_s22  ;;  %1028 = vrot.lane.b32.xlu0 %v3323_v41, %s2408_s22 }
 0x1e1   : > { %v1432_v21 = vpop.permute.xlu1 %1431  ;;  %v1591_v13 = vpop.permute.xlu0 %1590 }
 0x1e2   : > { %1506 = vst.msk [vmem:[#allocation3 + $0xb0] sm:$0xff] %vm1483_vm8, %v1432_v21 }
 0x1e3   : > { %1058 = vrot.lane.b32.xlu1 %v1543_v15, %s2408_s22  ;;  %1682 = vst.msk [vmem:[#allocation3 + $0x28] sm:$0xff] %vm1676_vm9, %v1591_v13  ;;  %1060 = vrot.lane.b32.xlu0 %v3330_v43, %s2408_s22 }
 0x1e5   : > { %v1589_v4 = vpop.permute.xlu1 %1588  ;;  %v1623_v48 = vpop.permute.xlu0 %1622 }
 0x1e6   : > { %1681 = vst.msk [vmem:[#allocation3 + $0x20] sm:$0xff] %vm1676_vm9, %v1589_v4  ;;  %1698 = vst.msk [vmem:[#allocation3 + $0xa8] sm:$0xff] %vm1676_vm9, %v1623_v48 }
 0x1e7   : > { %1030 = vrot.lane.b32.xlu1 %v3334_v56, %s2408_s22  ;;  %1217 = vrot.lane.b32.xlu0 %v1719_v1, %s2409_s23  ;;  %v1530_v1 = vld [vmem:[#allocation2 + $0xd9] sm:$0xff] }
 0x1e9   : > { %v1621_v45 = vpop.permute.xlu1 %1620  ;;  %v1595_v35 = vpop.permute.xlu0 %1594 }
 0x1ea   : > { %1697 = vst.msk [vmem:[#allocation3 + $0xa0] sm:$0xff] %vm1676_vm9, %v1621_v45  ;;  %1684 = vst.msk [vmem:[#allocation3 + $0x38] sm:$0xff] %vm1676_vm9, %v1595_v35 }
 0x1eb   : > { %1062 = vrot.lane.b32.xlu1 %v3342_v51, %s2408_s22  ;;  %1249 = vrot.lane.b32.xlu0 %v1735_v2, %s2409_s23  ;;  %v1546_v2 = vld [vmem:[#allocation2 + $0x199] sm:$0xff] }
 0x1ed   : > { %v1593_v46 = vpop.permute.xlu1 %1592  ;;  %v1627_v33 = vpop.permute.xlu0 %1626 }
 0x1ee   : > { %1683 = vst.msk [vmem:[#allocation3 + $0x30] sm:$0xff] %vm1676_vm9, %v1593_v46  ;;  %1700 = vst.msk [vmem:[#allocation3 + $0xb8] sm:$0xff] %vm1676_vm9, %v1627_v33 }
 0x1ef   : > { %1219 = vrot.lane.b32.xlu1 %v1720_v34, %s2409_s23  ;;  %1221 = vrot.lane.b32.xlu0 %v3351_v6, %s2409_s23  ;;  %v1531_v34 = vld [vmem:[#allocation2 + $0xe1] sm:$0xff] }
 0x1f1   : > { %v1625_v44 = vpop.permute.xlu1 %1624  ;;  %v1784_v54 = vpop.permute.xlu0 %1783 }
 0x1f2   : > { %1699 = vst.msk [vmem:[#allocation3 + $0xb0] sm:$0xff] %vm1676_vm9, %v1625_v44 }
 0x1f3   : > { %1251 = vrot.lane.b32.xlu1 %v1736_v3, %s2409_s23  ;;  %1875 = vst.msk [vmem:[#allocation3 + $0x28] sm:$0xff] %vm1869_vm10, %v1784_v54  ;;  %1253 = vrot.lane.b32.xlu0 %v3358_v50, %s2409_s23  ;;  %v1547_v3 = vld [vmem:[#allocation2 + $0x1a1] sm:$0xff] }
 0x1f5   : > { %v1782_v59 = vpop.permute.xlu1 %1781  ;;  %v1816_v14 = vpop.permute.xlu0 %1815 }
 0x1f6   : > { %1874 = vst.msk [vmem:[#allocation3 + $0x20] sm:$0xff] %vm1869_vm10, %v1782_v59  ;;  %1891 = vst.msk [vmem:[#allocation3 + $0xa8] sm:$0xff] %vm1869_vm10, %v1816_v14 }
 0x1f7   : > { %1223 = vrot.lane.b32.xlu1 %v3362_v49, %s2409_s23  ;;  %1411 = vrot.lane.b32.xlu0 %v1335_v55, %s2410_s24 }
 0x1f9   : > { %v1814_v16 = vpop.permute.xlu1 %1813  ;;  %v1788_v61 = vpop.permute.xlu0 %1787 }
 0x1fa   : > { %1890 = vst.msk [vmem:[#allocation3 + $0xa0] sm:$0xff] %vm1869_vm10, %v1814_v16  ;;  %v1907_v5 = vld [vmem:[#allocation3 + $0x28] sm:$0xff]  ;;  %1877 = vst.msk [vmem:[#allocation3 + $0x38] sm:$0xff] %vm1869_vm10, %v1788_v61 }
 0x1fb   : > { %1255 = vrot.lane.b32.xlu1 %v3370_v9, %s2409_s23  ;;  %1443 = vrot.lane.b32.xlu0 %v1351_v8, %s2410_s24 }
 0x1fd   : > { %v1786_v57 = vpop.permute.xlu1 %1785  ;;  %v1906_v18 = vld [vmem:[#allocation3 + $0x20] sm:$0xff]  ;;  %v1820_v19 = vpop.permute.xlu0 %1819  ;;  %v1923_v20 = vld [vmem:[#allocation3 + $0xa8] sm:$0xff] }
 0x1fe   : > { %1876 = vst.msk [vmem:[#allocation3 + $0x30] sm:$0xff] %vm1869_vm10, %v1786_v57  ;;  %v1936_v22 = vpack.c.bf16 %v1907_v5, %v1906_v18  ;;  %1893 = vst.msk [vmem:[#allocation3 + $0xb8] sm:$0xff] %vm1869_vm10, %v1820_v19 }
 0x1ff   : > { %1413 = vrot.lane.b32.xlu1 %v1336_v58, %s2410_s24  ;;  %1415 = vrot.lane.b32.xlu0 %v1337_v12, %s2410_s24 }
 0x200   : > { %2340 = vmatprep.mubr.msk.bf16.mxu0 %vm1977_vm11, %v1936_v22 }
 0x201   : > { %v1818_v10 = vpop.permute.xlu1 %1817  ;;  %v1922_v7 = vld [vmem:[#allocation3 + $0xa0] sm:$0xff]  ;;  %v1909_v36 = vld [vmem:[#allocation3 + $0x38] sm:$0xff]  ;;  %v1051_v28 = vpop.permute.xlu0 %1050 }
 0x202   : > { %1892 = vst.msk [vmem:[#allocation3 + $0xb0] sm:$0xff] %vm1869_vm10, %v1818_v10  ;;  %v1944_v29 = vpack.c.bf16 %v1923_v20, %v1922_v7 }
 0x203   : > { %1445 = vrot.lane.b32.xlu1 %v1352_v52, %s2410_s24  ;;  %1122 = vst.msk [vmem:[#allocation3 + $0xc8] sm:$0xff] %vm1096_vm6, %v1051_v28  ;;  %1447 = vrot.lane.b32.xlu0 %v1353_v31, %s2410_s24 }
 0x204   : > { %2356 = vmatprep.mubr.msk.bf16.mxu1 %vm1977_vm11, %v1944_v29 }
 0x205   : > { %v1049_v17 = vpop.permute.xlu1 %1048  ;;  %v1908_v11 = vld [vmem:[#allocation3 + $0x30] sm:$0xff]  ;;  %v1925_v39 = vld [vmem:[#allocation3 + $0xb8] sm:$0xff]  ;;  %v1053_v60 = vpop.permute.xlu0 %1052 }
 0x206   : > { %1121 = vst.msk [vmem:[#allocation3 + $0xc0] sm:$0xff] %vm1096_vm6, %v1049_v17  ;;  %v1937_v53 = vpack.c.bf16 %v1909_v36, %v1908_v11  ;;  %1123 = vst.msk [vmem:[#allocation3 + $0xd0] sm:$0xff] %vm1096_vm6, %v1053_v60 }
 0x207   : > { %1417 = vrot.lane.b32.xlu1 %v1338_v24, %s2410_s24  ;;  %1604 = vrot.lane.b32.xlu0 %v3323_v41, %s2411_s25  ;;  %v1723_v41 = vld [vmem:[#allocation2 + $0xda] sm:$0xff] }
 0x208   : > { %2341 = vmatmul.mubr.msk.bf16.gmra.mxu0 %vm1977_vm11, %v1937_v53 }
 0x209   : > { %v1023_v62 = vpop.permute.xlu1 %1022  ;;  %v1924_v15 = vld [vmem:[#allocation3 + $0xb0] sm:$0xff]  ;;  %v1210_v63 = vpop.permute.xlu0 %1209 }
 0x20a   : > { %1108 = vst.msk [vmem:[#allocation3 + $0x58] sm:$0xff] %vm1096_vm6, %v1023_v62  ;;  %v1945_v0 = vpack.c.bf16 %v1925_v39, %v1924_v15 }
 0x20b   : > { %1449 = vrot.lane.b32.xlu1 %v1354_v23, %s2410_s24  ;;  %1298 = vst.msk [vmem:[#allocation3 + $0x40] sm:$0xff] %vm1289_vm7, %v1210_v63  ;;  %1636 = vrot.lane.b32.xlu0 %v3330_v43, %s2411_s25  ;;  %v1739_v43 = vld [vmem:[#allocation2 + $0x19a] sm:$0xff] }
 0x20c   : > { %2357 = vmatmul.mubr.msk.bf16.gmra.mxu1 %vm1977_vm11, %v1945_v0 }
 0x20d   : > { %v1055_v47 = vpop.permute.xlu1 %1054  ;;  %v1242_v25 = vpop.permute.xlu0 %1241 }
 0x20e   : > { %1124 = vst.msk [vmem:[#allocation3 + $0xd8] sm:$0xff] %vm1096_vm6, %v1055_v47 }
 0x20f   : > { %1606 = vrot.lane.b32.xlu1 %v3334_v56, %s2411_s25  ;;  %1314 = vst.msk [vmem:[#allocation3 + $0xc0] sm:$0xff] %vm1289_vm7, %v1242_v25  ;;  %1608 = vrot.lane.b32.xlu0 %v1530_v1, %s2411_s25  ;;  %v1724_v56 = vld [vmem:[#allocation2 + $0xe2] sm:$0xff] }
 0x211   : > { %v1212_v37 = vpop.permute.xlu1 %1211  ;;  %v1214_v26 = vpop.permute.xlu0 %1213 }
 0x212   : > { %1299 = vst.msk [vmem:[#allocation3 + $0x48] sm:$0xff] %vm1289_vm7, %v1212_v37  ;;  %1300 = vst.msk [vmem:[#allocation3 + $0x50] sm:$0xff] %vm1289_vm7, %v1214_v26 }
 0x213   : > { %1638 = vrot.lane.b32.xlu1 %v3342_v51, %s2411_s25  ;;  %1640 = vrot.lane.b32.xlu0 %v1546_v2, %s2411_s25  ;;  %v1740_v51 = vld [vmem:[#allocation2 + $0x1a2] sm:$0xff] }
 0x215   : > { %v1244_v27 = vpop.permute.xlu1 %1243  ;;  %v1246_v30 = vpop.permute.xlu0 %1245 }
 0x216   : > { %1315 = vst.msk [vmem:[#allocation3 + $0xc8] sm:$0xff] %vm1289_vm7, %v1244_v27  ;;  %1316 = vst.msk [vmem:[#allocation3 + $0xd0] sm:$0xff] %vm1289_vm7, %v1246_v30 }
 0x217   : > { %1610 = vrot.lane.b32.xlu1 %v1531_v34, %s2411_s25  ;;  %1797 = vrot.lane.b32.xlu0 %v3351_v6, %s2412_s30 }
 0x219   : > { %v1216_v32 = vpop.permute.xlu1 %1215  ;;  %v1404_v38 = vpop.permute.xlu0 %1403 }
 0x21a   : > { %1301 = vst.msk [vmem:[#allocation3 + $0x58] sm:$0xff] %vm1289_vm7, %v1216_v32 }
 0x21b   : > { %1642 = vrot.lane.b32.xlu1 %v1547_v3, %s2411_s25  ;;  %1492 = vst.msk [vmem:[#allocation3 + $0x40] sm:$0xff] %vm1483_vm8, %v1404_v38  ;;  %1829 = vrot.lane.b32.xlu0 %v3358_v50, %s2412_s30 }
 0x21d   : > { %v1248_v40 = vpop.permute.xlu1 %1247  ;;  %v1436_v42 = vpop.permute.xlu0 %1435 }
 0x21e   : > { %1317 = vst.msk [vmem:[#allocation3 + $0xd8] sm:$0xff] %vm1289_vm7, %v1248_v40 }
 0x21f   : > { %1799 = vrot.lane.b32.xlu1 %v3362_v49, %s2412_s30  ;;  %1508 = vst.msk [vmem:[#allocation3 + $0xc0] sm:$0xff] %vm1483_vm8, %v1436_v42  ;;  %1801 = vrot.lane.b32.xlu0 %v1723_v41, %s2412_s30  ;;  %v3484_v41 = vld [vmem:[%s3581_s2] ss:$0 sm:$0xff] }
 0x221   : > { %v1406_v21 = vpop.permute.xlu1 %1405  ;;  %v1408_v13 = vpop.permute.xlu0 %1407 }
 0x222   : > { %1493 = vst.msk [vmem:[#allocation3 + $0x48] sm:$0xff] %vm1483_vm8, %v1406_v21  ;;  %1494 = vst.msk [vmem:[#allocation3 + $0x50] sm:$0xff] %vm1483_vm8, %v1408_v13 }
 0x223   : > { %1831 = vrot.lane.b32.xlu1 %v3370_v9, %s2412_s30  ;;  %1833 = vrot.lane.b32.xlu0 %v1739_v43, %s2412_s30 }
 0x225   : > { %v1438_v4 = vpop.permute.xlu1 %1437  ;;  %v1440_v48 = vpop.permute.xlu0 %1439 }
 0x226   : > { %1509 = vst.msk [vmem:[#allocation3 + $0xc8] sm:$0xff] %vm1483_vm8, %v1438_v4  ;;  %1510 = vst.msk [vmem:[#allocation3 + $0xd0] sm:$0xff] %vm1483_vm8, %v1440_v48 }
 0x227   : > { %1803 = vrot.lane.b32.xlu1 %v1724_v56, %s2412_s30 }
 0x229   : > { %v1410_v45 = vpop.permute.xlu1 %1409  ;;  %v1597_v35 = vpop.permute.xlu0 %1596 }
 0x22a   : > { %1495 = vst.msk [vmem:[#allocation3 + $0x58] sm:$0xff] %vm1483_vm8, %v1410_v45 }
 0x22b   : > { %1835 = vrot.lane.b32.xlu1 %v1740_v51, %s2412_s30  ;;  %1685 = vst.msk [vmem:[#allocation3 + $0x40] sm:$0xff] %vm1676_vm9, %v1597_v35 }
 0x22d   : > { %v1442_v46 = vpop.permute.xlu1 %1441  ;;  %v1629_v6 = vpop.permute.xlu0 %1628 }
 0x22e   : > { %1511 = vst.msk [vmem:[#allocation3 + $0xd8] sm:$0xff] %vm1483_vm8, %v1442_v46 }
 0x22f   : > { %1701 = vst.msk [vmem:[#allocation3 + $0xc0] sm:$0xff] %vm1676_vm9, %v1629_v6 }
 0x231   : > { %v1599_v33 = vpop.permute.xlu1 %1598  ;;  %v1601_v44 = vpop.permute.xlu0 %1600 }
 0x232   : > { %1686 = vst.msk [vmem:[#allocation3 + $0x48] sm:$0xff] %vm1676_vm9, %v1599_v33  ;;  %1687 = vst.msk [vmem:[#allocation3 + $0x50] sm:$0xff] %vm1676_vm9, %v1601_v44 }
 0x235   : > { %v1631_v50 = vpop.permute.xlu1 %1630  ;;  %v1633_v54 = vpop.permute.xlu0 %1632 }
 0x236   : > { %1702 = vst.msk [vmem:[#allocation3 + $0xc8] sm:$0xff] %vm1676_vm9, %v1631_v50  ;;  %1703 = vst.msk [vmem:[#allocation3 + $0xd0] sm:$0xff] %vm1676_vm9, %v1633_v54 }
 0x239   : > { %v1603_v49 = vpop.permute.xlu1 %1602  ;;  %v1790_v59 = vpop.permute.xlu0 %1789 }
 0x23a   : > { %1688 = vst.msk [vmem:[#allocation3 + $0x58] sm:$0xff] %vm1676_vm9, %v1603_v49 }
 0x23b   : > { %1878 = vst.msk [vmem:[#allocation3 + $0x40] sm:$0xff] %vm1869_vm10, %v1790_v59 }
 0x23d   : > { %v1635_v55 = vpop.permute.xlu1 %1634  ;;  %v1822_v14 = vpop.permute.xlu0 %1821 }
 0x23e   : > { %1704 = vst.msk [vmem:[#allocation3 + $0xd8] sm:$0xff] %vm1676_vm9, %v1635_v55 }
 0x23f   : > { %1894 = vst.msk [vmem:[#allocation3 + $0xc0] sm:$0xff] %vm1869_vm10, %v1822_v14 }
 0x241   : > { %v1792_v9 = vpop.permute.xlu1 %1791  ;;  %v1794_v16 = vpop.permute.xlu0 %1793 }
 0x242   : > { %1879 = vst.msk [vmem:[#allocation3 + $0x48] sm:$0xff] %vm1869_vm10, %v1792_v9  ;;  %1880 = vst.msk [vmem:[#allocation3 + $0x50] sm:$0xff] %vm1869_vm10, %v1794_v16  ;;  %v1910_v61 = vld [vmem:[#allocation3 + $0x40] sm:$0xff] }
 0x245   : > { %v1824_v8 = vpop.permute.xlu1 %1823  ;;  %v1826_v5 = vpop.permute.xlu0 %1825 }
 0x246   : > { %1895 = vst.msk [vmem:[#allocation3 + $0xc8] sm:$0xff] %vm1869_vm10, %v1824_v8  ;;  %1896 = vst.msk [vmem:[#allocation3 + $0xd0] sm:$0xff] %vm1869_vm10, %v1826_v5  ;;  %v1926_v22 = vld [vmem:[#allocation3 + $0xc0] sm:$0xff] }
 0x249   : > { %v1796_v58 = vpop.permute.xlu1 %1795  ;;  %v1911_v57 = vld [vmem:[#allocation3 + $0x48] sm:$0xff]  ;;  %v1025_v12 = vpop.permute.xlu0 %1024  ;;  %v1912_v10 = vld [vmem:[#allocation3 + $0x50] sm:$0xff] }
 0x24a   : > { %1881 = vst.msk [vmem:[#allocation3 + $0x58] sm:$0xff] %vm1869_vm10, %v1796_v58  ;;  %v1938_v18 = vpack.c.bf16 %v1911_v57, %v1910_v61 }
 0x24b   : > { %1109 = vst.msk [vmem:[#allocation3 + $0x60] sm:$0xff] %vm1096_vm6, %v1025_v12 }
 0x24c   : > { %2344 = vmatprep.mubr.msk.bf16.mxu0 %vm1977_vm11, %v1938_v18 }
 0x24d   : > { %v1828_v19 = vpop.permute.xlu1 %1827  ;;  %v1927_v20 = vld [vmem:[#allocation3 + $0xc8] sm:$0xff]  ;;  %v1057_v7 = vpop.permute.xlu0 %1056  ;;  %v1928_v28 = vld [vmem:[#allocation3 + $0xd0] sm:$0xff] }
 0x24e   : > { %1897 = vst.msk [vmem:[#allocation3 + $0xd8] sm:$0xff] %vm1869_vm10, %v1828_v19  ;;  %v1946_v52 = vpack.c.bf16 %v1927_v20, %v1926_v22 }
 0x24f   : > { %1125 = vst.msk [vmem:[#allocation3 + $0xe0] sm:$0xff] %vm1096_vm6, %v1057_v7 }
 0x250   : > { %2360 = vmatprep.mubr.msk.bf16.mxu1 %vm1977_vm11, %v1946_v52 }
 0x251   : > { %v1027_v29 = vpop.permute.xlu1 %1026  ;;  %v1913_v31 = vld [vmem:[#allocation3 + $0x58] sm:$0xff]  ;;  %v1029_v24 = vpop.permute.xlu0 %1028 }
 0x252   : > { %1110 = vst.msk [vmem:[#allocation3 + $0x68] sm:$0xff] %vm1096_vm6, %v1027_v29  ;;  %v1939_v36 = vpack.c.bf16 %v1913_v31, %v1912_v10  ;;  %1111 = vst.msk [vmem:[#allocation3 + $0x70] sm:$0xff] %vm1096_vm6, %v1029_v24 }
 0x254   : > { %2345 = vmatmul.mubr.msk.bf16.gmra.mxu0 %vm1977_vm11, %v1939_v36 }
 0x255   : > { %v1059_v17 = vpop.permute.xlu1 %1058  ;;  %v1929_v11 = vld [vmem:[#allocation3 + $0xd8] sm:$0xff]  ;;  %v1061_v39 = vpop.permute.xlu0 %1060 }
 0x256   : > { %1126 = vst.msk [vmem:[#allocation3 + $0xe8] sm:$0xff] %vm1096_vm6, %v1059_v17  ;;  %v1947_v53 = vpack.c.bf16 %v1929_v11, %v1928_v28  ;;  %1127 = vst.msk [vmem:[#allocation3 + $0xf0] sm:$0xff] %vm1096_vm6, %v1061_v39 }
 0x258   : > { %2361 = vmatmul.mubr.msk.bf16.gmra.mxu1 %vm1977_vm11, %v1947_v53 }
 0x259   : > { %v1031_v60 = vpop.permute.xlu1 %1030  ;;  %v1218_v23 = vpop.permute.xlu0 %1217 }
 0x25a   : > { %1112 = vst.msk [vmem:[#allocation3 + $0x78] sm:$0xff] %vm1096_vm6, %v1031_v60 }
 0x25b   : > { %1302 = vst.msk [vmem:[#allocation3 + $0x60] sm:$0xff] %vm1289_vm7, %v1218_v23 }
 0x25d   : > { %v1063_v62 = vpop.permute.xlu1 %1062  ;;  %v1250_v15 = vpop.permute.xlu0 %1249 }
 0x25e   : > { %1128 = vst.msk [vmem:[#allocation3 + $0xf8] sm:$0xff] %vm1096_vm6, %v1063_v62 }
 0x25f   : > { %1318 = vst.msk [vmem:[#allocation3 + $0xe0] sm:$0xff] %vm1289_vm7, %v1250_v15 }
 0x261   : > { %v1220_v0 = vpop.permute.xlu1 %1219  ;;  %v1222_v63 = vpop.permute.xlu0 %1221 }
 0x262   : > { %1303 = vst.msk [vmem:[#allocation3 + $0x68] sm:$0xff] %vm1289_vm7, %v1220_v0  ;;  %1304 = vst.msk [vmem:[#allocation3 + $0x70] sm:$0xff] %vm1289_vm7, %v1222_v63 }
 0x265   : > { %v1252_v47 = vpop.permute.xlu1 %1251  ;;  %v1254_v1 = vpop.permute.xlu0 %1253 }
 0x266   : > { %1319 = vst.msk [vmem:[#allocation3 + $0xe8] sm:$0xff] %vm1289_vm7, %v1252_v47  ;;  %1320 = vst.msk [vmem:[#allocation3 + $0xf0] sm:$0xff] %vm1289_vm7, %v1254_v1 }
 0x269   : > { %v1224_v25 = vpop.permute.xlu1 %1223  ;;  %v1412_v37 = vpop.permute.xlu0 %1411 }
 0x26a   : > { %1305 = vst.msk [vmem:[#allocation3 + $0x78] sm:$0xff] %vm1289_vm7, %v1224_v25 }
 0x26b   : > { %1496 = vst.msk [vmem:[#allocation3 + $0x60] sm:$0xff] %vm1483_vm8, %v1412_v37 }
 0x26d   : > { %v1256_v2 = vpop.permute.xlu1 %1255  ;;  %v1444_v26 = vpop.permute.xlu0 %1443 }
 0x26e   : > { %1321 = vst.msk [vmem:[#allocation3 + $0xf8] sm:$0xff] %vm1289_vm7, %v1256_v2 }
 0x26f   : > { %1512 = vst.msk [vmem:[#allocation3 + $0xe0] sm:$0xff] %vm1483_vm8, %v1444_v26 }
 0x271   : > { %v1414_v34 = vpop.permute.xlu1 %1413  ;;  %v1416_v27 = vpop.permute.xlu0 %1415 }
 0x272   : > { %1497 = vst.msk [vmem:[#allocation3 + $0x68] sm:$0xff] %vm1483_vm8, %v1414_v34  ;;  %1498 = vst.msk [vmem:[#allocation3 + $0x70] sm:$0xff] %vm1483_vm8, %v1416_v27 }
 0x275   : > { %v1446_v30 = vpop.permute.xlu1 %1445  ;;  %v1448_v3 = vpop.permute.xlu0 %1447 }
 0x276   : > { %1513 = vst.msk [vmem:[#allocation3 + $0xe8] sm:$0xff] %vm1483_vm8, %v1446_v30  ;;  %1514 = vst.msk [vmem:[#allocation3 + $0xf0] sm:$0xff] %vm1483_vm8, %v1448_v3 }
 0x279   : > { %v1418_v32 = vpop.permute.xlu1 %1417  ;;  %v1605_v38 = vpop.permute.xlu0 %1604 }
 0x27a   : > { %1499 = vst.msk [vmem:[#allocation3 + $0x78] sm:$0xff] %vm1483_vm8, %v1418_v32 }
 0x27b   : > { %1689 = vst.msk [vmem:[#allocation3 + $0x60] sm:$0xff] %vm1676_vm9, %v1605_v38 }
 0x27d   : > { %v1450_v40 = vpop.permute.xlu1 %1449  ;;  %v1637_v42 = vpop.permute.xlu0 %1636 }
 0x27e   : > { %1515 = vst.msk [vmem:[#allocation3 + $0xf8] sm:$0xff] %vm1483_vm8, %v1450_v40 }
 0x27f   : > { %1705 = vst.msk [vmem:[#allocation3 + $0xe0] sm:$0xff] %vm1676_vm9, %v1637_v42 }
 0x280   : > { %v2338_v21 = vpop.f32.mrf.mxu0 }
 0x281   : > { %v2073_v43 = vadd.f32 %v2338_v21, %v3484_v41  ;;  %v1607_v13 = vpop.permute.xlu1 %1606  ;;  %v1609_v48 = vpop.permute.xlu0 %1608 }
 0x282   : > { %1690 = vst.msk [vmem:[#allocation3 + $0x68] sm:$0xff] %vm1676_vm9, %v1607_v13  ;;  %v2064_v56 = vpop.f32.mrf.mxu0  ;;  %1691 = vst.msk [vmem:[#allocation3 + $0x70] sm:$0xff] %vm1676_vm9, %v1609_v48 }
 0x283   : > { %2193 = vst [vmem:[%s3491_s10 + $0x10] sm:$0xff] %v2073_v43  ;;  %v2065_v4 = vadd.f32 %v3484_v41, %v2064_v56 }
 0x284   : > { %v2339_v51 = vpop.f32.mrf.mxu0  ;;  %v2354_v45 = vpop.f32.mrf.mxu1 }
 0x285   : > { %2191 = vst [vmem:[%s3491_s10] sm:$0xff] %v2065_v4  ;;  %v2076_v35 = vadd.f32 %v2339_v51, %v3484_v41  ;;  %v2137_v46 = vadd.f32 %v2354_v45, %v3484_v41  ;;  %v1639_v6 = vpop.permute.xlu1 %1638  ;;  %v1641_v49 = vpop.permute.xlu0 %1640 }
 0x286   : > { %1706 = vst.msk [vmem:[#allocation3 + $0xe8] sm:$0xff] %vm1676_vm9, %v1639_v6  ;;  %v2067_v33 = vpop.f32.mrf.mxu0  ;;  %v2128_v44 = vpop.f32.mrf.mxu1  ;;  %1707 = vst.msk [vmem:[#allocation3 + $0xf0] sm:$0xff] %vm1676_vm9, %v1641_v49 }
 0x287   : > { %2194 = vst [vmem:[%s3491_s10 + $0x18] sm:$0xff] %v2076_v35  ;;  %2209 = vst [vmem:[%s3491_s10 + $0x90] sm:$0xff] %v2137_v46  ;;  %v2068_v50 = vadd.f32 %v3484_v41, %v2067_v33  ;;  %v2129_v54 = vadd.f32 %v3484_v41, %v2128_v44 }
 0x288   : > { %v2355_v59 = vpop.f32.mrf.mxu1 }
 0x289   : > { %2192 = vst [vmem:[%s3491_s10 + $0x8] sm:$0xff] %v2068_v50  ;;  %2207 = vst [vmem:[%s3491_s10 + $0x80] sm:$0xff] %v2129_v54  ;;  %v2140_v55 = vadd.f32 %v2355_v59, %v3484_v41  ;;  %v1611_v14 = vpop.permute.xlu1 %1610  ;;  %v1798_v8 = vpop.permute.xlu0 %1797 }
 0x28a   : > { %1692 = vst.msk [vmem:[#allocation3 + $0x78] sm:$0xff] %vm1676_vm9, %v1611_v14  ;;  %v2131_v9 = vpop.f32.mrf.mxu1 }
 0x28b   : > { %2210 = vst [vmem:[%s3491_s10 + $0x98] sm:$0xff] %v2140_v55  ;;  %v2132_v16 = vadd.f32 %v3484_v41, %v2131_v9  ;;  %1882 = vst.msk [vmem:[#allocation3 + $0x60] sm:$0xff] %vm1869_vm10, %v1798_v8 }
 0x28d   : > { %2208 = vst [vmem:[%s3491_s10 + $0x88] sm:$0xff] %v2132_v16  ;;  %v1643_v61 = vpop.permute.xlu1 %1642  ;;  %v1830_v5 = vpop.permute.xlu0 %1829 }
 0x28e   : > { %1708 = vst.msk [vmem:[#allocation3 + $0xf8] sm:$0xff] %vm1676_vm9, %v1643_v61 }
 0x28f   : > { %1898 = vst.msk [vmem:[#allocation3 + $0xe0] sm:$0xff] %vm1869_vm10, %v1830_v5 }
 0x291   : > { %v1800_v58 = vpop.permute.xlu1 %1799  ;;  %v1802_v57 = vpop.permute.xlu0 %1801 }
 0x292   : > { %1883 = vst.msk [vmem:[#allocation3 + $0x68] sm:$0xff] %vm1869_vm10, %v1800_v58  ;;  %1884 = vst.msk [vmem:[#allocation3 + $0x70] sm:$0xff] %vm1869_vm10, %v1802_v57  ;;  %v1914_v22 = vld [vmem:[#allocation3 + $0x60] sm:$0xff] }
 0x295   : > { %v1832_v18 = vpop.permute.xlu1 %1831  ;;  %v1834_v12 = vpop.permute.xlu0 %1833 }
 0x296   : > { %1899 = vst.msk [vmem:[#allocation3 + $0xe8] sm:$0xff] %vm1869_vm10, %v1832_v18  ;;  %1900 = vst.msk [vmem:[#allocation3 + $0xf0] sm:$0xff] %vm1869_vm10, %v1834_v12  ;;  %v1930_v10 = vld [vmem:[#allocation3 + $0xe0] sm:$0xff] }
 0x299   : > { %v1804_v19 = vpop.permute.xlu1 %1803  ;;  %v1915_v20 = vld [vmem:[#allocation3 + $0x68] sm:$0xff]  ;;  %v1916_v36 = vld [vmem:[#allocation3 + $0x70] sm:$0xff] }
 0x29a   : > { %1885 = vst.msk [vmem:[#allocation3 + $0x78] sm:$0xff] %vm1869_vm10, %v1804_v19  ;;  %v1940_v52 = vpack.c.bf16 %v1915_v20, %v1914_v22 }
 0x29c   : > { %2348 = vmatprep.mubr.msk.bf16.mxu0 %vm1977_vm11, %v1940_v52 }
 0x29d   : > { %v1836_v7 = vpop.permute.xlu1 %1835  ;;  %v1931_v29 = vld [vmem:[#allocation3 + $0xe8] sm:$0xff]  ;;  %v1932_v17 = vld [vmem:[#allocation3 + $0xf0] sm:$0xff] }
 0x29e   : > { %1901 = vst.msk [vmem:[#allocation3 + $0xf8] sm:$0xff] %vm1869_vm10, %v1836_v7  ;;  %v1948_v31 = vpack.c.bf16 %v1931_v29, %v1930_v10 }
 0x2a0   : > { %2364 = vmatprep.mubr.msk.bf16.mxu1 %vm1977_vm11, %v1948_v31 }
 0x2a1   : > { %v1917_v28 = vld [vmem:[#allocation3 + $0x78] sm:$0xff] }
 0x2a2   : > { %v1941_v24 = vpack.c.bf16 %v1917_v28, %v1916_v36 }
 0x2a4   : > { %2349 = vmatmul.mubr.msk.bf16.gmra.mxu0 %vm1977_vm11, %v1941_v24 }
 0x2a5   : > { %v1933_v11 = vld [vmem:[#allocation3 + $0xf8] sm:$0xff] }
 0x2a6   : > { %v1949_v53 = vpack.c.bf16 %v1933_v11, %v1932_v17 }
 0x2a8   : > { %2365 = vmatmul.mubr.msk.bf16.gmra.mxu1 %vm1977_vm11, %v1949_v53 }
 0x2c8   : > { %v2342_v39 = vpop.f32.mrf.mxu0 }
 0x2c9   : > { %v2089_v60 = vadd.f32 %v2342_v39, %v3484_v41 }
 0x2ca   : > { %v2080_v23 = vpop.f32.mrf.mxu0 }
 0x2cb   : > { %2197 = vst [vmem:[%s3491_s10 + $0x30] sm:$0xff] %v2089_v60  ;;  %v2081_v62 = vadd.f32 %v3484_v41, %v2080_v23 }
 0x2cc   : > { %v2343_v15 = vpop.f32.mrf.mxu0  ;;  %v2358_v0 = vpop.f32.mrf.mxu1 }
 0x2cd   : > { %2195 = vst [vmem:[%s3491_s10 + $0x20] sm:$0xff] %v2081_v62  ;;  %v2092_v63 = vadd.f32 %v2343_v15, %v3484_v41  ;;  %v2153_v47 = vadd.f32 %v2358_v0, %v3484_v41 }
 0x2ce   : > { %v2083_v1 = vpop.f32.mrf.mxu0  ;;  %v2144_v25 = vpop.f32.mrf.mxu1 }
 0x2cf   : > { %2198 = vst [vmem:[%s3491_s10 + $0x38] sm:$0xff] %v2092_v63  ;;  %2213 = vst [vmem:[%s3491_s10 + $0xb0] sm:$0xff] %v2153_v47  ;;  %v2084_v37 = vadd.f32 %v3484_v41, %v2083_v1  ;;  %v2145_v2 = vadd.f32 %v3484_v41, %v2144_v25 }
 0x2d0   : > { %v2359_v26 = vpop.f32.mrf.mxu1 }
 0x2d1   : > { %2196 = vst [vmem:[%s3491_s10 + $0x28] sm:$0xff] %v2084_v37  ;;  %2211 = vst [vmem:[%s3491_s10 + $0xa0] sm:$0xff] %v2145_v2  ;;  %v2156_v34 = vadd.f32 %v2359_v26, %v3484_v41 }
 0x2d2   : > { %v2147_v27 = vpop.f32.mrf.mxu1 }
 0x2d3   : > { %2214 = vst [vmem:[%s3491_s10 + $0xb8] sm:$0xff] %v2156_v34  ;;  %v2148_v30 = vadd.f32 %v3484_v41, %v2147_v27 }
 0x2d5   : > { %2212 = vst [vmem:[%s3491_s10 + $0xa8] sm:$0xff] %v2148_v30 }
 0x314   : > { %v2346_v3 = vpop.f32.mrf.mxu0 }
 0x315   : > { %v2105_v32 = vadd.f32 %v2346_v3, %v3484_v41 }
 0x316   : > { %v2096_v38 = vpop.f32.mrf.mxu0 }
 0x317   : > { %2201 = vst [vmem:[%s3491_s10 + $0x50] sm:$0xff] %v2105_v32  ;;  %v2097_v40 = vadd.f32 %v3484_v41, %v2096_v38 }
 0x318   : > { %v2347_v42 = vpop.f32.mrf.mxu0  ;;  %v2362_v21 = vpop.f32.mrf.mxu1 }
 0x319   : > { %2199 = vst [vmem:[%s3491_s10 + $0x40] sm:$0xff] %v2097_v40  ;;  %v2108_v43 = vadd.f32 %v2347_v42, %v3484_v41  ;;  %v2169_v13 = vadd.f32 %v2362_v21, %v3484_v41 }
 0x31a   : > { %v2099_v56 = vpop.f32.mrf.mxu0  ;;  %v2160_v4 = vpop.f32.mrf.mxu1 }
 0x31b   : > { %2202 = vst [vmem:[%s3491_s10 + $0x58] sm:$0xff] %v2108_v43  ;;  %2217 = vst [vmem:[%s3491_s10 + $0xd0] sm:$0xff] %v2169_v13  ;;  %v2100_v48 = vadd.f32 %v3484_v41, %v2099_v56  ;;  %v2161_v51 = vadd.f32 %v3484_v41, %v2160_v4 }
 0x31c   : > { %v2363_v45 = vpop.f32.mrf.mxu1 }
 0x31d   : > { %2200 = vst [vmem:[%s3491_s10 + $0x48] sm:$0xff] %v2100_v48  ;;  %2215 = vst [vmem:[%s3491_s10 + $0xc0] sm:$0xff] %v2161_v51  ;;  %v2172_v35 = vadd.f32 %v2363_v45, %v3484_v41 }
 0x31e   : > { %v2163_v46 = vpop.f32.mrf.mxu1 }
 0x31f   : > { %2218 = vst [vmem:[%s3491_s10 + $0xd8] sm:$0xff] %v2172_v35  ;;  %v2164_v6 = vadd.f32 %v3484_v41, %v2163_v46 }
 0x321   : > { %2216 = vst [vmem:[%s3491_s10 + $0xc8] sm:$0xff] %v2164_v6 }
 0x364   : > { %v2350_v33 = vpop.f32.mrf.mxu0 }
 0x365   : > { %v2121_v44 = vadd.f32 %v2350_v33, %v3484_v41 }
 0x366   : > { %v2112_v50 = vpop.f32.mrf.mxu0 }
 0x367   : > { %2205 = vst [vmem:[%s3491_s10 + $0x70] sm:$0xff] %v2121_v44  ;;  %v2113_v54 = vadd.f32 %v3484_v41, %v2112_v50 }
 0x368   : > { %v2351_v49 = vpop.f32.mrf.mxu0  ;;  %v2366_v59 = vpop.f32.mrf.mxu1 }
 0x369   : > { %2203 = vst [vmem:[%s3491_s10 + $0x60] sm:$0xff] %v2113_v54  ;;  %v2124_v55 = vadd.f32 %v2351_v49, %v3484_v41  ;;  %v2185_v14 = vadd.f32 %v2366_v59, %v3484_v41 }
 0x36a   : > { %v2115_v9 = vpop.f32.mrf.mxu0  ;;  %v2176_v16 = vpop.f32.mrf.mxu1 }
 0x36b   : > { %2206 = vst [vmem:[%s3491_s10 + $0x78] sm:$0xff] %v2124_v55  ;;  %2221 = vst [vmem:[%s3491_s10 + $0xf0] sm:$0xff] %v2185_v14  ;;  %v2116_v8 = vadd.f32 %v3484_v41, %v2115_v9  ;;  %v2177_v61 = vadd.f32 %v3484_v41, %v2176_v16 }
 0x36c   : > { %v2367_v5 = vpop.f32.mrf.mxu1 }
 0x36d   : > { %2204 = vst [vmem:[%s3491_s10 + $0x68] sm:$0xff] %v2116_v8  ;;  %2219 = vst [vmem:[%s3491_s10 + $0xe0] sm:$0xff] %v2177_v61  ;;  %v2188_v58 = vadd.f32 %v2367_v5, %v3484_v41 }
 0x36e   : > { %v2179_v57 = vpop.f32.mrf.mxu1 }
 0x36f   : > { %2222 = vst [vmem:[%s3491_s10 + $0xf8] sm:$0xff] %v2188_v58  ;;  %v2180_v18 = vadd.f32 %v3484_v41, %v2179_v57 }
 0x371   : > { %2220 = vst [vmem:[%s3491_s10 + $0xe8] sm:$0xff] %v2180_v18 }
 0x372 PF: > { %s13_s12 = sadd.s32 1, %s2402_s12  }
 0x373   : > { %p10_p4 = scmp.ge.s32.totalorder %s13_s12, 4  }
 0x375   :  { %12 = sbr.rel (!%p10_p4) target bundleno = 1 (0x1), region = 64 }

</bundles_post_ra>
